<compile_context>
chip_gen: v5e
topology: v5e:2x2
jax: 0.10.0
libtpu: 0.0.40
codegen_flags: <defaults>
</compile_context>

<pallas_src>
import jax
import jax.numpy as jnp
from jax.experimental import pallas as pl
from jax.experimental.pallas import tpu as pltpu

IMG = 28
PIX = IMG * IMG            # 784
LANE = 128
N_CHUNKS = 7               # ceil(784 / 128)
PIX_PAD = N_CHUNKS * LANE  # 896
C_MORPH = 10
STRIP = 8                  # sublane strip height (one f32 vreg worth of rows)
OUT_LANES = 128            # lane-dense output slab width
OUT_OFF, HIT_OFF, MISS_OFF = 0, 16, 32
SENTINEL = -1e30           # pad value for K lanes: x-pad=0 -> padded terms never win


def _round_up(n, m):
    return (n + m - 1) // m * m


def morphnet_kernel(x_ref, k_ref, out_ref):
    """x_ref (TB, 896); k_ref (160, 896) = [hit ch0..9 | miss ch0..9], each channel
    replicated across 8 sublanes; out_ref (TB, 128) lane-dense slab."""
    n_strips = x_ref.shape[0] // STRIP
    lane_idx = jax.lax.broadcasted_iota(jnp.int32, (STRIP, OUT_LANES), 1)

    @pl.loop(0, n_strips)
    def _(s):
        row = pl.multiple_of(s * STRIP, STRIP)

        # Load the full 896-pixel strip once (7 aligned (8,128) vregs); all 10 channels'
        # hit AND miss folds reuse these resident vregs.
        x_chunks = [x_ref[pl.ds(row, STRIP), k * LANE:(k + 1) * LANE]
                    for k in range(N_CHUNKS)]

        slab = jnp.zeros((STRIP, OUT_LANES), jnp.float32)
        for c in range(C_MORPH):                          # static unroll, 10 channels
            kh = c * STRIP                                # hit rows for channel c
            km = (C_MORPH + c) * STRIP                    # miss rows for channel c

            # Fused hit/miss chunk folds; SE slices are already (8,128) -> pure VALU.
            hit_acc = x_chunks[0] - k_ref[kh:kh + STRIP, 0:LANE]
            miss_acc = x_chunks[0] + k_ref[km:km + STRIP, 0:LANE]
            for k in range(1, N_CHUNKS):
                sl = slice(k * LANE, (k + 1) * LANE)
                hit_acc = jnp.minimum(hit_acc, x_chunks[k] - k_ref[kh:kh + STRIP, sl])
                miss_acc = jnp.maximum(miss_acc, x_chunks[k] + k_ref[km:km + STRIP, sl])

            hit_c = jnp.min(hit_acc, axis=-1, keepdims=True)     # (8, 1)
            miss_c = jnp.max(miss_acc, axis=-1, keepdims=True)   # (8, 1)

            # Lane-select into the strip slab (unused lanes stay zero).
            slab = jnp.where(lane_idx == OUT_OFF + c, hit_c - miss_c, slab)
            slab = jnp.where(lane_idx == HIT_OFF + c, hit_c, slab)
            slab = jnp.where(lane_idx == MISS_OFF + c, miss_c, slab)

        # One unmasked full-width (8,128) store per strip.
        out_ref[pl.ds(row, STRIP), :] = slab


def init_params(key):
    k1, k2 = jax.random.split(key)
    # MNN(1, 10, 28): hit / miss structuring elements, PyTorch-style (10, 1, 28, 28)
    k_hit = jax.random.normal(k1, (C_MORPH, 1, IMG, IMG), jnp.float32) * 0.05
    k_miss = jax.random.normal(k2, (C_MORPH, 1, IMG, IMG), jnp.float32) * 0.05
    return dict(k_hit=k_hit, k_miss=k_miss)


def _pad_se(k):
    """(10, 1, 28, 28) -> (80, 896): SENTINEL-padded lanes, replicated over 8 sublanes."""
    flat = k.reshape(C_MORPH, PIX).astype(jnp.float32)
    flat = jnp.pad(flat, ((0, 0), (0, PIX_PAD - PIX)), constant_values=SENTINEL)
    return jnp.broadcast_to(flat[:, None, :], (C_MORPH, STRIP, PIX_PAD)).reshape(
        C_MORPH * STRIP, PIX_PAD)


def morphnet_forward(x, params, epoch=None, experiment=None, *, tb=512):
    # TODO(synk): MNN source was not provided; standard hit-or-miss (hit=min(x-K_hit),
    # miss=max(x+K_miss), output=hit-miss) is implemented. epoch/experiment filter-plot
    # hooks are logging-only and are no-ops here.
    B = x.shape[0]
    assert x.shape[1:] == (1, IMG, IMG)
    x_flat = x.reshape(B, PIX).astype(jnp.float32)

    b8 = _round_up(B, STRIP)
    tb_eff = min(tb, b8)
    if tb_eff == b8 and b8 >= 2 * STRIP:
        # Single-tile-sized batch: split into >= 2 tiles so dimension_semantics=("parallel",)
        # actually feeds both TensorCores on v7x.
        tb_eff = _round_up((b8 + 1) // 2, STRIP)
    b_pad = _round_up(b8, tb_eff)

    x_pad = jnp.pad(x_flat, ((0, b_pad - B), (0, PIX_PAD - PIX)))   # zero pad (x pad = 0)

    # Single grid-invariant SE operand: hit rows [0:80), miss rows [80:160).
    k_all = jnp.concatenate([_pad_se(params["k_hit"]), _pad_se(params["k_miss"])], axis=0)

    grid = (b_pad // tb_eff,)
    flops = 4 * b_pad * C_MORPH * PIX
    bytes_accessed = (b_pad * PIX_PAD + 2 * C_MORPH * STRIP * PIX_PAD
                      + b_pad * OUT_LANES) * 4

    slab = pl.pallas_call(
        morphnet_kernel,
        out_shape=jax.ShapeDtypeStruct((b_pad, OUT_LANES), jnp.float32),
        grid=grid,
        in_specs=[
            pl.BlockSpec((tb_eff, PIX_PAD), lambda i: (i, 0)),               # x tiles
            pl.BlockSpec((2 * C_MORPH * STRIP, PIX_PAD), lambda i: (0, 0)),  # K resident
        ],
        out_specs=pl.BlockSpec((tb_eff, OUT_LANES), lambda i: (i, 0)),
        compiler_params=pltpu.CompilerParams(
            dimension_semantics=("parallel",)),
        cost_estimate=pl.CostEstimate(flops=flops, transcendentals=0,
                                      bytes_accessed=bytes_accessed),
    )(x_pad, k_all)

    output = slab[:B, OUT_OFF:OUT_OFF + C_MORPH].reshape(B, C_MORPH, 1, 1)
    hit = slab[:B, HIT_OFF:HIT_OFF + C_MORPH].reshape(B, C_MORPH, 1, 1)
    miss = slab[:B, MISS_OFF:MISS_OFF + C_MORPH].reshape(B, C_MORPH, 1, 1)
    return output, hit, miss


if __name__ == "__main__":
    key = jax.random.PRNGKey(0)
    k_x, k_p = jax.random.split(key)
    x = jax.random.normal(k_x, (2, 1, IMG, IMG), jnp.float32)   # NCHW, like PyTorch
    params = init_params(k_p)

    fwd = jax.jit(morphnet_forward)
    output, hit, miss = fwd(x, params)
    jax.block_until_ready((output, hit, miss))

    assert output.shape == (2, C_MORPH, 1, 1)
    assert hit.shape == (2, C_MORPH, 1, 1)
    assert miss.shape == (2, C_MORPH, 1, 1)

    # Pure-JAX reference check of the assumed hit-or-miss semantics.
    xf = x.reshape(2, PIX)
    kh = params["k_hit"].reshape(C_MORPH, PIX)
    km = params["k_miss"].reshape(C_MORPH, PIX)
    ref_hit = jnp.min(xf[:, None, :] - kh[None, :, :], axis=-1)
    ref_miss = jnp.max(xf[:, None, :] + km[None, :, :], axis=-1)
    ref_out = ref_hit - ref_miss
    assert jnp.allclose(hit.reshape(2, C_MORPH), ref_hit, atol=1e-5)
    assert jnp.allclose(miss.reshape(2, C_MORPH), ref_miss, atol=1e-5)
    assert jnp.allclose(output.reshape(2, C_MORPH), ref_out, atol=1e-5)

    print("KERNEL_OK")
</pallas_src>

<mosaic_0001>
module attributes {stable_mosaic.version = 11 : i64} {
  func.func @morphnet_kernel(%arg0: i32, %arg1: memref<8x896xf32, #tpu.memory_space<vmem>>, %arg2: memref<160x896xf32, #tpu.memory_space<vmem>>, %arg3: memref<8x128xf32, #tpu.memory_space<vmem>>) attributes {dimension_semantics = [#tpu.dimension_semantics<parallel>], iteration_bounds = array<i64: 1>, scalar_prefetch = 0 : i64, scratch_operands = 0 : i64, tpu.core_type = #tpu.core_type<tc>, window_params = [{transform_indices = @transform_0, window_bounds = array<i64: 8, 896>}, {pipeline_mode = #tpu.pipeline_mode<synchronous>, transform_indices = @transform_1, window_bounds = array<i64: 160, 896>}, {transform_indices = @transform_2, window_bounds = array<i64: 8, 128>}]} {
    %0 = tpu.iota {dimensions = array<i32: 1>} : vector<8x128xi32>
    %c0_i32 = arith.constant 0 : i32
    %c1_i32 = arith.constant 1 : i32
    %1 = arith.muli %c0_i32, %c1_i32 : i32
    %c0_i32_0 = arith.constant 0 : i32
    %2 = arith.addi %c0_i32_0, %1 : i32
    %c8_i32 = arith.constant 8 : i32
    %3 = arith.muli %2, %c8_i32 : i32
    %4 = tpu.assume_multiple %3, 8 : i32
    %5 = arith.index_cast %4 : i32 to index
    %c0 = arith.constant 0 : index
    %6 = vector.load %arg1[%5, %c0] : memref<8x896xf32, #tpu.memory_space<vmem>>, vector<8x128xf32>
    %7 = arith.index_cast %4 : i32 to index
    %c128 = arith.constant 128 : index
    %8 = vector.load %arg1[%7, %c128] : memref<8x896xf32, #tpu.memory_space<vmem>>, vector<8x128xf32>
    %9 = arith.index_cast %4 : i32 to index
    %c256 = arith.constant 256 : index
    %10 = vector.load %arg1[%9, %c256] : memref<8x896xf32, #tpu.memory_space<vmem>>, vector<8x128xf32>
    %11 = arith.index_cast %4 : i32 to index
    %c384 = arith.constant 384 : index
    %12 = vector.load %arg1[%11, %c384] : memref<8x896xf32, #tpu.memory_space<vmem>>, vector<8x128xf32>
    %13 = arith.index_cast %4 : i32 to index
    %c512 = arith.constant 512 : index
    %14 = vector.load %arg1[%13, %c512] : memref<8x896xf32, #tpu.memory_space<vmem>>, vector<8x128xf32>
    %15 = arith.index_cast %4 : i32 to index
    %c640 = arith.constant 640 : index
    %16 = vector.load %arg1[%15, %c640] : memref<8x896xf32, #tpu.memory_space<vmem>>, vector<8x128xf32>
    %17 = arith.index_cast %4 : i32 to index
    %c768 = arith.constant 768 : index
    %18 = vector.load %arg1[%17, %c768] : memref<8x896xf32, #tpu.memory_space<vmem>>, vector<8x128xf32>
    %cst = arith.constant 0.000000e+00 : f32
    %19 = vector.broadcast %cst : f32 to vector<8x128xf32>
    %c0_1 = arith.constant 0 : index
    %c0_2 = arith.constant 0 : index
    %20 = vector.load %arg2[%c0_1, %c0_2] : memref<160x896xf32, #tpu.memory_space<vmem>>, vector<8x128xf32>
    %21 = arith.subf %6, %20 : vector<8x128xf32>
    %c80 = arith.constant 80 : index
    %c0_3 = arith.constant 0 : index
    %22 = vector.load %arg2[%c80, %c0_3] : memref<160x896xf32, #tpu.memory_space<vmem>>, vector<8x128xf32>
    %23 = arith.addf %6, %22 : vector<8x128xf32>
    %c0_4 = arith.constant 0 : index
    %c128_5 = arith.constant 128 : index
    %24 = vector.load %arg2[%c0_4, %c128_5] : memref<160x896xf32, #tpu.memory_space<vmem>>, vector<8x128xf32>
    %25 = arith.subf %8, %24 : vector<8x128xf32>
    %26 = arith.minimumf %21, %25 : vector<8x128xf32>
    %c80_6 = arith.constant 80 : index
    %c128_7 = arith.constant 128 : index
    %27 = vector.load %arg2[%c80_6, %c128_7] : memref<160x896xf32, #tpu.memory_space<vmem>>, vector<8x128xf32>
    %28 = arith.addf %8, %27 : vector<8x128xf32>
    %29 = arith.maximumf %23, %28 : vector<8x128xf32>
    %c0_8 = arith.constant 0 : index
    %c256_9 = arith.constant 256 : index
    %30 = vector.load %arg2[%c0_8, %c256_9] : memref<160x896xf32, #tpu.memory_space<vmem>>, vector<8x128xf32>
    %31 = arith.subf %10, %30 : vector<8x128xf32>
    %32 = arith.minimumf %26, %31 : vector<8x128xf32>
    %c80_10 = arith.constant 80 : index
    %c256_11 = arith.constant 256 : index
    %33 = vector.load %arg2[%c80_10, %c256_11] : memref<160x896xf32, #tpu.memory_space<vmem>>, vector<8x128xf32>
    %34 = arith.addf %10, %33 : vector<8x128xf32>
    %35 = arith.maximumf %29, %34 : vector<8x128xf32>
    %c0_12 = arith.constant 0 : index
    %c384_13 = arith.constant 384 : index
    %36 = vector.load %arg2[%c0_12, %c384_13] : memref<160x896xf32, #tpu.memory_space<vmem>>, vector<8x128xf32>
    %37 = arith.subf %12, %36 : vector<8x128xf32>
    %38 = arith.minimumf %32, %37 : vector<8x128xf32>
    %c80_14 = arith.constant 80 : index
    %c384_15 = arith.constant 384 : index
    %39 = vector.load %arg2[%c80_14, %c384_15] : memref<160x896xf32, #tpu.memory_space<vmem>>, vector<8x128xf32>
    %40 = arith.addf %12, %39 : vector<8x128xf32>
    %41 = arith.maximumf %35, %40 : vector<8x128xf32>
    %c0_16 = arith.constant 0 : index
    %c512_17 = arith.constant 512 : index
    %42 = vector.load %arg2[%c0_16, %c512_17] : memref<160x896xf32, #tpu.memory_space<vmem>>, vector<8x128xf32>
    %43 = arith.subf %14, %42 : vector<8x128xf32>
    %44 = arith.minimumf %38, %43 : vector<8x128xf32>
    %c80_18 = arith.constant 80 : index
    %c512_19 = arith.constant 512 : index
    %45 = vector.load %arg2[%c80_18, %c512_19] : memref<160x896xf32, #tpu.memory_space<vmem>>, vector<8x128xf32>
    %46 = arith.addf %14, %45 : vector<8x128xf32>
    %47 = arith.maximumf %41, %46 : vector<8x128xf32>
    %c0_20 = arith.constant 0 : index
    %c640_21 = arith.constant 640 : index
    %48 = vector.load %arg2[%c0_20, %c640_21] : memref<160x896xf32, #tpu.memory_space<vmem>>, vector<8x128xf32>
    %49 = arith.subf %16, %48 : vector<8x128xf32>
    %50 = arith.minimumf %44, %49 : vector<8x128xf32>
    %c80_22 = arith.constant 80 : index
    %c640_23 = arith.constant 640 : index
    %51 = vector.load %arg2[%c80_22, %c640_23] : memref<160x896xf32, #tpu.memory_space<vmem>>, vector<8x128xf32>
    %52 = arith.addf %16, %51 : vector<8x128xf32>
    %53 = arith.maximumf %47, %52 : vector<8x128xf32>
    %c0_24 = arith.constant 0 : index
    %c768_25 = arith.constant 768 : index
    %54 = vector.load %arg2[%c0_24, %c768_25] : memref<160x896xf32, #tpu.memory_space<vmem>>, vector<8x128xf32>
    %55 = arith.subf %18, %54 : vector<8x128xf32>
    %56 = arith.minimumf %50, %55 : vector<8x128xf32>
    %c80_26 = arith.constant 80 : index
    %c768_27 = arith.constant 768 : index
    %57 = vector.load %arg2[%c80_26, %c768_27] : memref<160x896xf32, #tpu.memory_space<vmem>>, vector<8x128xf32>
    %58 = arith.addf %18, %57 : vector<8x128xf32>
    %59 = arith.maximumf %53, %58 : vector<8x128xf32>
    %cst_28 = arith.constant dense<0x7F800000> : vector<8xf32>
    %60 = vector.multi_reduction <minimumf>, %56, %cst_28 [1] : vector<8x128xf32> to vector<8xf32>
    %61 = vector.shape_cast %60 : vector<8xf32> to vector<8x1xf32>
    %cst_29 = arith.constant dense<0xFF800000> : vector<8xf32>
    %62 = vector.multi_reduction <maximumf>, %59, %cst_29 [1] : vector<8x128xf32> to vector<8xf32>
    %63 = vector.shape_cast %62 : vector<8xf32> to vector<8x1xf32>
    %c0_i32_30 = arith.constant 0 : i32
    %64 = vector.broadcast %c0_i32_30 : i32 to vector<8x128xi32>
    %65 = arith.cmpi eq, %0, %64 : vector<8x128xi32>
    %66 = arith.subf %61, %63 : vector<8x1xf32>
    %67 = vector.shape_cast %66 : vector<8x1xf32> to vector<8x1xf32>
    %68 = vector.broadcast %67 : vector<8x1xf32> to vector<8x128xf32>
    %69 = arith.select %65, %68, %19 : vector<8x128xi1>, vector<8x128xf32>
    %c16_i32 = arith.constant 16 : i32
    %70 = vector.broadcast %c16_i32 : i32 to vector<8x128xi32>
    %71 = arith.cmpi eq, %0, %70 : vector<8x128xi32>
    %72 = vector.shape_cast %61 : vector<8x1xf32> to vector<8x1xf32>
    %73 = vector.broadcast %72 : vector<8x1xf32> to vector<8x128xf32>
    %74 = arith.select %71, %73, %69 : vector<8x128xi1>, vector<8x128xf32>
    %c32_i32 = arith.constant 32 : i32
    %75 = vector.broadcast %c32_i32 : i32 to vector<8x128xi32>
    %76 = arith.cmpi eq, %0, %75 : vector<8x128xi32>
    %77 = vector.shape_cast %63 : vector<8x1xf32> to vector<8x1xf32>
    %78 = vector.broadcast %77 : vector<8x1xf32> to vector<8x128xf32>
    %79 = arith.select %76, %78, %74 : vector<8x128xi1>, vector<8x128xf32>
    %c8 = arith.constant 8 : index
    %c0_31 = arith.constant 0 : index
    %80 = vector.load %arg2[%c8, %c0_31] : memref<160x896xf32, #tpu.memory_space<vmem>>, vector<8x128xf32>
    %81 = arith.subf %6, %80 : vector<8x128xf32>
    %c88 = arith.constant 88 : index
    %c0_32 = arith.constant 0 : index
    %82 = vector.load %arg2[%c88, %c0_32] : memref<160x896xf32, #tpu.memory_space<vmem>>, vector<8x128xf32>
    %83 = arith.addf %6, %82 : vector<8x128xf32>
    %c8_33 = arith.constant 8 : index
    %c128_34 = arith.constant 128 : index
    %84 = vector.load %arg2[%c8_33, %c128_34] : memref<160x896xf32, #tpu.memory_space<vmem>>, vector<8x128xf32>
    %85 = arith.subf %8, %84 : vector<8x128xf32>
    %86 = arith.minimumf %81, %85 : vector<8x128xf32>
    %c88_35 = arith.constant 88 : index
    %c128_36 = arith.constant 128 : index
    %87 = vector.load %arg2[%c88_35, %c128_36] : memref<160x896xf32, #tpu.memory_space<vmem>>, vector<8x128xf32>
    %88 = arith.addf %8, %87 : vector<8x128xf32>
    %89 = arith.maximumf %83, %88 : vector<8x128xf32>
    %c8_37 = arith.constant 8 : index
    %c256_38 = arith.constant 256 : index
    %90 = vector.load %arg2[%c8_37, %c256_38] : memref<160x896xf32, #tpu.memory_space<vmem>>, vector<8x128xf32>
    %91 = arith.subf %10, %90 : vector<8x128xf32>
    %92 = arith.minimumf %86, %91 : vector<8x128xf32>
    %c88_39 = arith.constant 88 : index
    %c256_40 = arith.constant 256 : index
    %93 = vector.load %arg2[%c88_39, %c256_40] : memref<160x896xf32, #tpu.memory_space<vmem>>, vector<8x128xf32>
    %94 = arith.addf %10, %93 : vector<8x128xf32>
    %95 = arith.maximumf %89, %94 : vector<8x128xf32>
    %c8_41 = arith.constant 8 : index
    %c384_42 = arith.constant 384 : index
    %96 = vector.load %arg2[%c8_41, %c384_42] : memref<160x896xf32, #tpu.memory_space<vmem>>, vector<8x128xf32>
    %97 = arith.subf %12, %96 : vector<8x128xf32>
    %98 = arith.minimumf %92, %97 : vector<8x128xf32>
    %c88_43 = arith.constant 88 : index
    %c384_44 = arith.constant 384 : index
    %99 = vector.load %arg2[%c88_43, %c384_44] : memref<160x896xf32, #tpu.memory_space<vmem>>, vector<8x128xf32>
    %100 = arith.addf %12, %99 : vector<8x128xf32>
    %101 = arith.maximumf %95, %100 : vector<8x128xf32>
    %c8_45 = arith.constant 8 : index
    %c512_46 = arith.constant 512 : index
    %102 = vector.load %arg2[%c8_45, %c512_46] : memref<160x896xf32, #tpu.memory_space<vmem>>, vector<8x128xf32>
    %103 = arith.subf %14, %102 : vector<8x128xf32>
    %104 = arith.minimumf %98, %103 : vector<8x128xf32>
    %c88_47 = arith.constant 88 : index
    %c512_48 = arith.constant 512 : index
    %105 = vector.load %arg2[%c88_47, %c512_48] : memref<160x896xf32, #tpu.memory_space<vmem>>, vector<8x128xf32>
    %106 = arith.addf %14, %105 : vector<8x128xf32>
    %107 = arith.maximumf %101, %106 : vector<8x128xf32>
    %c8_49 = arith.constant 8 : index
    %c640_50 = arith.constant 640 : index
    %108 = vector.load %arg2[%c8_49, %c640_50] : memref<160x896xf32, #tpu.memory_space<vmem>>, vector<8x128xf32>
    %109 = arith.subf %16, %108 : vector<8x128xf32>
    %110 = arith.minimumf %104, %109 : vector<8x128xf32>
    %c88_51 = arith.constant 88 : index
    %c640_52 = arith.constant 640 : index
    %111 = vector.load %arg2[%c88_51, %c640_52] : memref<160x896xf32, #tpu.memory_space<vmem>>, vector<8x128xf32>
    %112 = arith.addf %16, %111 : vector<8x128xf32>
    %113 = arith.maximumf %107, %112 : vector<8x128xf32>
    %c8_53 = arith.constant 8 : index
    %c768_54 = arith.constant 768 : index
    %114 = vector.load %arg2[%c8_53, %c768_54] : memref<160x896xf32, #tpu.memory_space<vmem>>, vector<8x128xf32>
    %115 = arith.subf %18, %114 : vector<8x128xf32>
    %116 = arith.minimumf %110, %115 : vector<8x128xf32>
    %c88_55 = arith.constant 88 : index
    %c768_56 = arith.constant 768 : index
    %117 = vector.load %arg2[%c88_55, %c768_56] : memref<160x896xf32, #tpu.memory_space<vmem>>, vector<8x128xf32>
    %118 = arith.addf %18, %117 : vector<8x128xf32>
    %119 = arith.maximumf %113, %118 : vector<8x128xf32>
    %cst_57 = arith.constant dense<0x7F800000> : vector<8xf32>
    %120 = vector.multi_reduction <minimumf>, %116, %cst_57 [1] : vector<8x128xf32> to vector<8xf32>
    %121 = vector.shape_cast %120 : vector<8xf32> to vector<8x1xf32>
    %cst_58 = arith.constant dense<0xFF800000> : vector<8xf32>
    %122 = vector.multi_reduction <maximumf>, %119, %cst_58 [1] : vector<8x128xf32> to vector<8xf32>
    %123 = vector.shape_cast %122 : vector<8xf32> to vector<8x1xf32>
    %c1_i32_59 = arith.constant 1 : i32
    %124 = vector.broadcast %c1_i32_59 : i32 to vector<8x128xi32>
    %125 = arith.cmpi eq, %0, %124 : vector<8x128xi32>
    %126 = arith.subf %121, %123 : vector<8x1xf32>
    %127 = vector.shape_cast %126 : vector<8x1xf32> to vector<8x1xf32>
    %128 = vector.broadcast %127 : vector<8x1xf32> to vector<8x128xf32>
    %129 = arith.select %125, %128, %79 : vector<8x128xi1>, vector<8x128xf32>
    %c17_i32 = arith.constant 17 : i32
    %130 = vector.broadcast %c17_i32 : i32 to vector<8x128xi32>
    %131 = arith.cmpi eq, %0, %130 : vector<8x128xi32>
    %132 = vector.shape_cast %121 : vector<8x1xf32> to vector<8x1xf32>
    %133 = vector.broadcast %132 : vector<8x1xf32> to vector<8x128xf32>
    %134 = arith.select %131, %133, %129 : vector<8x128xi1>, vector<8x128xf32>
    %c33_i32 = arith.constant 33 : i32
    %135 = vector.broadcast %c33_i32 : i32 to vector<8x128xi32>
    %136 = arith.cmpi eq, %0, %135 : vector<8x128xi32>
    %137 = vector.shape_cast %123 : vector<8x1xf32> to vector<8x1xf32>
    %138 = vector.broadcast %137 : vector<8x1xf32> to vector<8x128xf32>
    %139 = arith.select %136, %138, %134 : vector<8x128xi1>, vector<8x128xf32>
    %c16 = arith.constant 16 : index
    %c0_60 = arith.constant 0 : index
    %140 = vector.load %arg2[%c16, %c0_60] : memref<160x896xf32, #tpu.memory_space<vmem>>, vector<8x128xf32>
    %141 = arith.subf %6, %140 : vector<8x128xf32>
    %c96 = arith.constant 96 : index
    %c0_61 = arith.constant 0 : index
    %142 = vector.load %arg2[%c96, %c0_61] : memref<160x896xf32, #tpu.memory_space<vmem>>, vector<8x128xf32>
    %143 = arith.addf %6, %142 : vector<8x128xf32>
    %c16_62 = arith.constant 16 : index
    %c128_63 = arith.constant 128 : index
    %144 = vector.load %arg2[%c16_62, %c128_63] : memref<160x896xf32, #tpu.memory_space<vmem>>, vector<8x128xf32>
    %145 = arith.subf %8, %144 : vector<8x128xf32>
    %146 = arith.minimumf %141, %145 : vector<8x128xf32>
    %c96_64 = arith.constant 96 : index
    %c128_65 = arith.constant 128 : index
    %147 = vector.load %arg2[%c96_64, %c128_65] : memref<160x896xf32, #tpu.memory_space<vmem>>, vector<8x128xf32>
    %148 = arith.addf %8, %147 : vector<8x128xf32>
    %149 = arith.maximumf %143, %148 : vector<8x128xf32>
    %c16_66 = arith.constant 16 : index
    %c256_67 = arith.constant 256 : index
    %150 = vector.load %arg2[%c16_66, %c256_67] : memref<160x896xf32, #tpu.memory_space<vmem>>, vector<8x128xf32>
    %151 = arith.subf %10, %150 : vector<8x128xf32>
    %152 = arith.minimumf %146, %151 : vector<8x128xf32>
    %c96_68 = arith.constant 96 : index
    %c256_69 = arith.constant 256 : index
    %153 = vector.load %arg2[%c96_68, %c256_69] : memref<160x896xf32, #tpu.memory_space<vmem>>, vector<8x128xf32>
    %154 = arith.addf %10, %153 : vector<8x128xf32>
    %155 = arith.maximumf %149, %154 : vector<8x128xf32>
    %c16_70 = arith.constant 16 : index
    %c384_71 = arith.constant 384 : index
    %156 = vector.load %arg2[%c16_70, %c384_71] : memref<160x896xf32, #tpu.memory_space<vmem>>, vector<8x128xf32>
    %157 = arith.subf %12, %156 : vector<8x128xf32>
    %158 = arith.minimumf %152, %157 : vector<8x128xf32>
    %c96_72 = arith.constant 96 : index
    %c384_73 = arith.constant 384 : index
    %159 = vector.load %arg2[%c96_72, %c384_73] : memref<160x896xf32, #tpu.memory_space<vmem>>, vector<8x128xf32>
    %160 = arith.addf %12, %159 : vector<8x128xf32>
    %161 = arith.maximumf %155, %160 : vector<8x128xf32>
    %c16_74 = arith.constant 16 : index
    %c512_75 = arith.constant 512 : index
    %162 = vector.load %arg2[%c16_74, %c512_75] : memref<160x896xf32, #tpu.memory_space<vmem>>, vector<8x128xf32>
    %163 = arith.subf %14, %162 : vector<8x128xf32>
    %164 = arith.minimumf %158, %163 : vector<8x128xf32>
    %c96_76 = arith.constant 96 : index
    %c512_77 = arith.constant 512 : index
    %165 = vector.load %arg2[%c96_76, %c512_77] : memref<160x896xf32, #tpu.memory_space<vmem>>, vector<8x128xf32>
    %166 = arith.addf %14, %165 : vector<8x128xf32>
    %167 = arith.maximumf %161, %166 : vector<8x128xf32>
    %c16_78 = arith.constant 16 : index
    %c640_79 = arith.constant 640 : index
    %168 = vector.load %arg2[%c16_78, %c640_79] : memref<160x896xf32, #tpu.memory_space<vmem>>, vector<8x128xf32>
    %169 = arith.subf %16, %168 : vector<8x128xf32>
    %170 = arith.minimumf %164, %169 : vector<8x128xf32>
    %c96_80 = arith.constant 96 : index
    %c640_81 = arith.constant 640 : index
    %171 = vector.load %arg2[%c96_80, %c640_81] : memref<160x896xf32, #tpu.memory_space<vmem>>, vector<8x128xf32>
    %172 = arith.addf %16, %171 : vector<8x128xf32>
    %173 = arith.maximumf %167, %172 : vector<8x128xf32>
    %c16_82 = arith.constant 16 : index
    %c768_83 = arith.constant 768 : index
    %174 = vector.load %arg2[%c16_82, %c768_83] : memref<160x896xf32, #tpu.memory_space<vmem>>, vector<8x128xf32>
    %175 = arith.subf %18, %174 : vector<8x128xf32>
    %176 = arith.minimumf %170, %175 : vector<8x128xf32>
    %c96_84 = arith.constant 96 : index
    %c768_85 = arith.constant 768 : index
    %177 = vector.load %arg2[%c96_84, %c768_85] : memref<160x896xf32, #tpu.memory_space<vmem>>, vector<8x128xf32>
    %178 = arith.addf %18, %177 : vector<8x128xf32>
    %179 = arith.maximumf %173, %178 : vector<8x128xf32>
    %cst_86 = arith.constant dense<0x7F800000> : vector<8xf32>
    %180 = vector.multi_reduction <minimumf>, %176, %cst_86 [1] : vector<8x128xf32> to vector<8xf32>
    %181 = vector.shape_cast %180 : vector<8xf32> to vector<8x1xf32>
    %cst_87 = arith.constant dense<0xFF800000> : vector<8xf32>
    %182 = vector.multi_reduction <maximumf>, %179, %cst_87 [1] : vector<8x128xf32> to vector<8xf32>
    %183 = vector.shape_cast %182 : vector<8xf32> to vector<8x1xf32>
    %c2_i32 = arith.constant 2 : i32
    %184 = vector.broadcast %c2_i32 : i32 to vector<8x128xi32>
    %185 = arith.cmpi eq, %0, %184 : vector<8x128xi32>
    %186 = arith.subf %181, %183 : vector<8x1xf32>
    %187 = vector.shape_cast %186 : vector<8x1xf32> to vector<8x1xf32>
    %188 = vector.broadcast %187 : vector<8x1xf32> to vector<8x128xf32>
    %189 = arith.select %185, %188, %139 : vector<8x128xi1>, vector<8x128xf32>
    %c18_i32 = arith.constant 18 : i32
    %190 = vector.broadcast %c18_i32 : i32 to vector<8x128xi32>
    %191 = arith.cmpi eq, %0, %190 : vector<8x128xi32>
    %192 = vector.shape_cast %181 : vector<8x1xf32> to vector<8x1xf32>
    %193 = vector.broadcast %192 : vector<8x1xf32> to vector<8x128xf32>
    %194 = arith.select %191, %193, %189 : vector<8x128xi1>, vector<8x128xf32>
    %c34_i32 = arith.constant 34 : i32
    %195 = vector.broadcast %c34_i32 : i32 to vector<8x128xi32>
    %196 = arith.cmpi eq, %0, %195 : vector<8x128xi32>
    %197 = vector.shape_cast %183 : vector<8x1xf32> to vector<8x1xf32>
    %198 = vector.broadcast %197 : vector<8x1xf32> to vector<8x128xf32>
    %199 = arith.select %196, %198, %194 : vector<8x128xi1>, vector<8x128xf32>
    %c24 = arith.constant 24 : index
    %c0_88 = arith.constant 0 : index
    %200 = vector.load %arg2[%c24, %c0_88] : memref<160x896xf32, #tpu.memory_space<vmem>>, vector<8x128xf32>
    %201 = arith.subf %6, %200 : vector<8x128xf32>
    %c104 = arith.constant 104 : index
    %c0_89 = arith.constant 0 : index
    %202 = vector.load %arg2[%c104, %c0_89] : memref<160x896xf32, #tpu.memory_space<vmem>>, vector<8x128xf32>
    %203 = arith.addf %6, %202 : vector<8x128xf32>
    %c24_90 = arith.constant 24 : index
    %c128_91 = arith.constant 128 : index
    %204 = vector.load %arg2[%c24_90, %c128_91] : memref<160x896xf32, #tpu.memory_space<vmem>>, vector<8x128xf32>
    %205 = arith.subf %8, %204 : vector<8x128xf32>
    %206 = arith.minimumf %201, %205 : vector<8x128xf32>
    %c104_92 = arith.constant 104 : index
    %c128_93 = arith.constant 128 : index
    %207 = vector.load %arg2[%c104_92, %c128_93] : memref<160x896xf32, #tpu.memory_space<vmem>>, vector<8x128xf32>
    %208 = arith.addf %8, %207 : vector<8x128xf32>
    %209 = arith.maximumf %203, %208 : vector<8x128xf32>
    %c24_94 = arith.constant 24 : index
    %c256_95 = arith.constant 256 : index
    %210 = vector.load %arg2[%c24_94, %c256_95] : memref<160x896xf32, #tpu.memory_space<vmem>>, vector<8x128xf32>
    %211 = arith.subf %10, %210 : vector<8x128xf32>
    %212 = arith.minimumf %206, %211 : vector<8x128xf32>
    %c104_96 = arith.constant 104 : index
    %c256_97 = arith.constant 256 : index
    %213 = vector.load %arg2[%c104_96, %c256_97] : memref<160x896xf32, #tpu.memory_space<vmem>>, vector<8x128xf32>
    %214 = arith.addf %10, %213 : vector<8x128xf32>
    %215 = arith.maximumf %209, %214 : vector<8x128xf32>
    %c24_98 = arith.constant 24 : index
    %c384_99 = arith.constant 384 : index
    %216 = vector.load %arg2[%c24_98, %c384_99] : memref<160x896xf32, #tpu.memory_space<vmem>>, vector<8x128xf32>
    %217 = arith.subf %12, %216 : vector<8x128xf32>
    %218 = arith.minimumf %212, %217 : vector<8x128xf32>
    %c104_100 = arith.constant 104 : index
    %c384_101 = arith.constant 384 : index
    %219 = vector.load %arg2[%c104_100, %c384_101] : memref<160x896xf32, #tpu.memory_space<vmem>>, vector<8x128xf32>
    %220 = arith.addf %12, %219 : vector<8x128xf32>
    %221 = arith.maximumf %215, %220 : vector<8x128xf32>
    %c24_102 = arith.constant 24 : index
    %c512_103 = arith.constant 512 : index
    %222 = vector.load %arg2[%c24_102, %c512_103] : memref<160x896xf32, #tpu.memory_space<vmem>>, vector<8x128xf32>
    %223 = arith.subf %14, %222 : vector<8x128xf32>
    %224 = arith.minimumf %218, %223 : vector<8x128xf32>
    %c104_104 = arith.constant 104 : index
    %c512_105 = arith.constant 512 : index
    %225 = vector.load %arg2[%c104_104, %c512_105] : memref<160x896xf32, #tpu.memory_space<vmem>>, vector<8x128xf32>
    %226 = arith.addf %14, %225 : vector<8x128xf32>
    %227 = arith.maximumf %221, %226 : vector<8x128xf32>
    %c24_106 = arith.constant 24 : index
    %c640_107 = arith.constant 640 : index
    %228 = vector.load %arg2[%c24_106, %c640_107] : memref<160x896xf32, #tpu.memory_space<vmem>>, vector<8x128xf32>
    %229 = arith.subf %16, %228 : vector<8x128xf32>
    %230 = arith.minimumf %224, %229 : vector<8x128xf32>
    %c104_108 = arith.constant 104 : index
    %c640_109 = arith.constant 640 : index
    %231 = vector.load %arg2[%c104_108, %c640_109] : memref<160x896xf32, #tpu.memory_space<vmem>>, vector<8x128xf32>
    %232 = arith.addf %16, %231 : vector<8x128xf32>
    %233 = arith.maximumf %227, %232 : vector<8x128xf32>
    %c24_110 = arith.constant 24 : index
    %c768_111 = arith.constant 768 : index
    %234 = vector.load %arg2[%c24_110, %c768_111] : memref<160x896xf32, #tpu.memory_space<vmem>>, vector<8x128xf32>
    %235 = arith.subf %18, %234 : vector<8x128xf32>
    %236 = arith.minimumf %230, %235 : vector<8x128xf32>
    %c104_112 = arith.constant 104 : index
    %c768_113 = arith.constant 768 : index
    %237 = vector.load %arg2[%c104_112, %c768_113] : memref<160x896xf32, #tpu.memory_space<vmem>>, vector<8x128xf32>
    %238 = arith.addf %18, %237 : vector<8x128xf32>
    %239 = arith.maximumf %233, %238 : vector<8x128xf32>
    %cst_114 = arith.constant dense<0x7F800000> : vector<8xf32>
    %240 = vector.multi_reduction <minimumf>, %236, %cst_114 [1] : vector<8x128xf32> to vector<8xf32>
    %241 = vector.shape_cast %240 : vector<8xf32> to vector<8x1xf32>
    %cst_115 = arith.constant dense<0xFF800000> : vector<8xf32>
    %242 = vector.multi_reduction <maximumf>, %239, %cst_115 [1] : vector<8x128xf32> to vector<8xf32>
    %243 = vector.shape_cast %242 : vector<8xf32> to vector<8x1xf32>
    %c3_i32 = arith.constant 3 : i32
    %244 = vector.broadcast %c3_i32 : i32 to vector<8x128xi32>
    %245 = arith.cmpi eq, %0, %244 : vector<8x128xi32>
    %246 = arith.subf %241, %243 : vector<8x1xf32>
    %247 = vector.shape_cast %246 : vector<8x1xf32> to vector<8x1xf32>
    %248 = vector.broadcast %247 : vector<8x1xf32> to vector<8x128xf32>
    %249 = arith.select %245, %248, %199 : vector<8x128xi1>, vector<8x128xf32>
    %c19_i32 = arith.constant 19 : i32
    %250 = vector.broadcast %c19_i32 : i32 to vector<8x128xi32>
    %251 = arith.cmpi eq, %0, %250 : vector<8x128xi32>
    %252 = vector.shape_cast %241 : vector<8x1xf32> to vector<8x1xf32>
    %253 = vector.broadcast %252 : vector<8x1xf32> to vector<8x128xf32>
    %254 = arith.select %251, %253, %249 : vector<8x128xi1>, vector<8x128xf32>
    %c35_i32 = arith.constant 35 : i32
    %255 = vector.broadcast %c35_i32 : i32 to vector<8x128xi32>
    %256 = arith.cmpi eq, %0, %255 : vector<8x128xi32>
    %257 = vector.shape_cast %243 : vector<8x1xf32> to vector<8x1xf32>
    %258 = vector.broadcast %257 : vector<8x1xf32> to vector<8x128xf32>
    %259 = arith.select %256, %258, %254 : vector<8x128xi1>, vector<8x128xf32>
    %c32 = arith.constant 32 : index
    %c0_116 = arith.constant 0 : index
    %260 = vector.load %arg2[%c32, %c0_116] : memref<160x896xf32, #tpu.memory_space<vmem>>, vector<8x128xf32>
    %261 = arith.subf %6, %260 : vector<8x128xf32>
    %c112 = arith.constant 112 : index
    %c0_117 = arith.constant 0 : index
    %262 = vector.load %arg2[%c112, %c0_117] : memref<160x896xf32, #tpu.memory_space<vmem>>, vector<8x128xf32>
    %263 = arith.addf %6, %262 : vector<8x128xf32>
    %c32_118 = arith.constant 32 : index
    %c128_119 = arith.constant 128 : index
    %264 = vector.load %arg2[%c32_118, %c128_119] : memref<160x896xf32, #tpu.memory_space<vmem>>, vector<8x128xf32>
    %265 = arith.subf %8, %264 : vector<8x128xf32>
    %266 = arith.minimumf %261, %265 : vector<8x128xf32>
    %c112_120 = arith.constant 112 : index
    %c128_121 = arith.constant 128 : index
    %267 = vector.load %arg2[%c112_120, %c128_121] : memref<160x896xf32, #tpu.memory_space<vmem>>, vector<8x128xf32>
    %268 = arith.addf %8, %267 : vector<8x128xf32>
    %269 = arith.maximumf %263, %268 : vector<8x128xf32>
    %c32_122 = arith.constant 32 : index
    %c256_123 = arith.constant 256 : index
    %270 = vector.load %arg2[%c32_122, %c256_123] : memref<160x896xf32, #tpu.memory_space<vmem>>, vector<8x128xf32>
    %271 = arith.subf %10, %270 : vector<8x128xf32>
    %272 = arith.minimumf %266, %271 : vector<8x128xf32>
    %c112_124 = arith.constant 112 : index
    %c256_125 = arith.constant 256 : index
    %273 = vector.load %arg2[%c112_124, %c256_125] : memref<160x896xf32, #tpu.memory_space<vmem>>, vector<8x128xf32>
    %274 = arith.addf %10, %273 : vector<8x128xf32>
    %275 = arith.maximumf %269, %274 : vector<8x128xf32>
    %c32_126 = arith.constant 32 : index
    %c384_127 = arith.constant 384 : index
    %276 = vector.load %arg2[%c32_126, %c384_127] : memref<160x896xf32, #tpu.memory_space<vmem>>, vector<8x128xf32>
    %277 = arith.subf %12, %276 : vector<8x128xf32>
    %278 = arith.minimumf %272, %277 : vector<8x128xf32>
    %c112_128 = arith.constant 112 : index
    %c384_129 = arith.constant 384 : index
    %279 = vector.load %arg2[%c112_128, %c384_129] : memref<160x896xf32, #tpu.memory_space<vmem>>, vector<8x128xf32>
    %280 = arith.addf %12, %279 : vector<8x128xf32>
    %281 = arith.maximumf %275, %280 : vector<8x128xf32>
    %c32_130 = arith.constant 32 : index
    %c512_131 = arith.constant 512 : index
    %282 = vector.load %arg2[%c32_130, %c512_131] : memref<160x896xf32, #tpu.memory_space<vmem>>, vector<8x128xf32>
    %283 = arith.subf %14, %282 : vector<8x128xf32>
    %284 = arith.minimumf %278, %283 : vector<8x128xf32>
    %c112_132 = arith.constant 112 : index
    %c512_133 = arith.constant 512 : index
    %285 = vector.load %arg2[%c112_132, %c512_133] : memref<160x896xf32, #tpu.memory_space<vmem>>, vector<8x128xf32>
    %286 = arith.addf %14, %285 : vector<8x128xf32>
    %287 = arith.maximumf %281, %286 : vector<8x128xf32>
    %c32_134 = arith.constant 32 : index
    %c640_135 = arith.constant 640 : index
    %288 = vector.load %arg2[%c32_134, %c640_135] : memref<160x896xf32, #tpu.memory_space<vmem>>, vector<8x128xf32>
    %289 = arith.subf %16, %288 : vector<8x128xf32>
    %290 = arith.minimumf %284, %289 : vector<8x128xf32>
    %c112_136 = arith.constant 112 : index
    %c640_137 = arith.constant 640 : index
    %291 = vector.load %arg2[%c112_136, %c640_137] : memref<160x896xf32, #tpu.memory_space<vmem>>, vector<8x128xf32>
    %292 = arith.addf %16, %291 : vector<8x128xf32>
    %293 = arith.maximumf %287, %292 : vector<8x128xf32>
    %c32_138 = arith.constant 32 : index
    %c768_139 = arith.constant 768 : index
    %294 = vector.load %arg2[%c32_138, %c768_139] : memref<160x896xf32, #tpu.memory_space<vmem>>, vector<8x128xf32>
    %295 = arith.subf %18, %294 : vector<8x128xf32>
    %296 = arith.minimumf %290, %295 : vector<8x128xf32>
    %c112_140 = arith.constant 112 : index
    %c768_141 = arith.constant 768 : index
    %297 = vector.load %arg2[%c112_140, %c768_141] : memref<160x896xf32, #tpu.memory_space<vmem>>, vector<8x128xf32>
    %298 = arith.addf %18, %297 : vector<8x128xf32>
    %299 = arith.maximumf %293, %298 : vector<8x128xf32>
    %cst_142 = arith.constant dense<0x7F800000> : vector<8xf32>
    %300 = vector.multi_reduction <minimumf>, %296, %cst_142 [1] : vector<8x128xf32> to vector<8xf32>
    %301 = vector.shape_cast %300 : vector<8xf32> to vector<8x1xf32>
    %cst_143 = arith.constant dense<0xFF800000> : vector<8xf32>
    %302 = vector.multi_reduction <maximumf>, %299, %cst_143 [1] : vector<8x128xf32> to vector<8xf32>
    %303 = vector.shape_cast %302 : vector<8xf32> to vector<8x1xf32>
    %c4_i32 = arith.constant 4 : i32
    %304 = vector.broadcast %c4_i32 : i32 to vector<8x128xi32>
    %305 = arith.cmpi eq, %0, %304 : vector<8x128xi32>
    %306 = arith.subf %301, %303 : vector<8x1xf32>
    %307 = vector.shape_cast %306 : vector<8x1xf32> to vector<8x1xf32>
    %308 = vector.broadcast %307 : vector<8x1xf32> to vector<8x128xf32>
    %309 = arith.select %305, %308, %259 : vector<8x128xi1>, vector<8x128xf32>
    %c20_i32 = arith.constant 20 : i32
    %310 = vector.broadcast %c20_i32 : i32 to vector<8x128xi32>
    %311 = arith.cmpi eq, %0, %310 : vector<8x128xi32>
    %312 = vector.shape_cast %301 : vector<8x1xf32> to vector<8x1xf32>
    %313 = vector.broadcast %312 : vector<8x1xf32> to vector<8x128xf32>
    %314 = arith.select %311, %313, %309 : vector<8x128xi1>, vector<8x128xf32>
    %c36_i32 = arith.constant 36 : i32
    %315 = vector.broadcast %c36_i32 : i32 to vector<8x128xi32>
    %316 = arith.cmpi eq, %0, %315 : vector<8x128xi32>
    %317 = vector.shape_cast %303 : vector<8x1xf32> to vector<8x1xf32>
    %318 = vector.broadcast %317 : vector<8x1xf32> to vector<8x128xf32>
    %319 = arith.select %316, %318, %314 : vector<8x128xi1>, vector<8x128xf32>
    %c40 = arith.constant 40 : index
    %c0_144 = arith.constant 0 : index
    %320 = vector.load %arg2[%c40, %c0_144] : memref<160x896xf32, #tpu.memory_space<vmem>>, vector<8x128xf32>
    %321 = arith.subf %6, %320 : vector<8x128xf32>
    %c120 = arith.constant 120 : index
    %c0_145 = arith.constant 0 : index
    %322 = vector.load %arg2[%c120, %c0_145] : memref<160x896xf32, #tpu.memory_space<vmem>>, vector<8x128xf32>
    %323 = arith.addf %6, %322 : vector<8x128xf32>
    %c40_146 = arith.constant 40 : index
    %c128_147 = arith.constant 128 : index
    %324 = vector.load %arg2[%c40_146, %c128_147] : memref<160x896xf32, #tpu.memory_space<vmem>>, vector<8x128xf32>
    %325 = arith.subf %8, %324 : vector<8x128xf32>
    %326 = arith.minimumf %321, %325 : vector<8x128xf32>
    %c120_148 = arith.constant 120 : index
    %c128_149 = arith.constant 128 : index
    %327 = vector.load %arg2[%c120_148, %c128_149] : memref<160x896xf32, #tpu.memory_space<vmem>>, vector<8x128xf32>
    %328 = arith.addf %8, %327 : vector<8x128xf32>
    %329 = arith.maximumf %323, %328 : vector<8x128xf32>
    %c40_150 = arith.constant 40 : index
    %c256_151 = arith.constant 256 : index
    %330 = vector.load %arg2[%c40_150, %c256_151] : memref<160x896xf32, #tpu.memory_space<vmem>>, vector<8x128xf32>
    %331 = arith.subf %10, %330 : vector<8x128xf32>
    %332 = arith.minimumf %326, %331 : vector<8x128xf32>
    %c120_152 = arith.constant 120 : index
    %c256_153 = arith.constant 256 : index
    %333 = vector.load %arg2[%c120_152, %c256_153] : memref<160x896xf32, #tpu.memory_space<vmem>>, vector<8x128xf32>
    %334 = arith.addf %10, %333 : vector<8x128xf32>
    %335 = arith.maximumf %329, %334 : vector<8x128xf32>
    %c40_154 = arith.constant 40 : index
    %c384_155 = arith.constant 384 : index
    %336 = vector.load %arg2[%c40_154, %c384_155] : memref<160x896xf32, #tpu.memory_space<vmem>>, vector<8x128xf32>
    %337 = arith.subf %12, %336 : vector<8x128xf32>
    %338 = arith.minimumf %332, %337 : vector<8x128xf32>
    %c120_156 = arith.constant 120 : index
    %c384_157 = arith.constant 384 : index
    %339 = vector.load %arg2[%c120_156, %c384_157] : memref<160x896xf32, #tpu.memory_space<vmem>>, vector<8x128xf32>
    %340 = arith.addf %12, %339 : vector<8x128xf32>
    %341 = arith.maximumf %335, %340 : vector<8x128xf32>
    %c40_158 = arith.constant 40 : index
    %c512_159 = arith.constant 512 : index
    %342 = vector.load %arg2[%c40_158, %c512_159] : memref<160x896xf32, #tpu.memory_space<vmem>>, vector<8x128xf32>
    %343 = arith.subf %14, %342 : vector<8x128xf32>
    %344 = arith.minimumf %338, %343 : vector<8x128xf32>
    %c120_160 = arith.constant 120 : index
    %c512_161 = arith.constant 512 : index
    %345 = vector.load %arg2[%c120_160, %c512_161] : memref<160x896xf32, #tpu.memory_space<vmem>>, vector<8x128xf32>
    %346 = arith.addf %14, %345 : vector<8x128xf32>
    %347 = arith.maximumf %341, %346 : vector<8x128xf32>
    %c40_162 = arith.constant 40 : index
    %c640_163 = arith.constant 640 : index
    %348 = vector.load %arg2[%c40_162, %c640_163] : memref<160x896xf32, #tpu.memory_space<vmem>>, vector<8x128xf32>
    %349 = arith.subf %16, %348 : vector<8x128xf32>
    %350 = arith.minimumf %344, %349 : vector<8x128xf32>
    %c120_164 = arith.constant 120 : index
    %c640_165 = arith.constant 640 : index
    %351 = vector.load %arg2[%c120_164, %c640_165] : memref<160x896xf32, #tpu.memory_space<vmem>>, vector<8x128xf32>
    %352 = arith.addf %16, %351 : vector<8x128xf32>
    %353 = arith.maximumf %347, %352 : vector<8x128xf32>
    %c40_166 = arith.constant 40 : index
    %c768_167 = arith.constant 768 : index
    %354 = vector.load %arg2[%c40_166, %c768_167] : memref<160x896xf32, #tpu.memory_space<vmem>>, vector<8x128xf32>
    %355 = arith.subf %18, %354 : vector<8x128xf32>
    %356 = arith.minimumf %350, %355 : vector<8x128xf32>
    %c120_168 = arith.constant 120 : index
    %c768_169 = arith.constant 768 : index
    %357 = vector.load %arg2[%c120_168, %c768_169] : memref<160x896xf32, #tpu.memory_space<vmem>>, vector<8x128xf32>
    %358 = arith.addf %18, %357 : vector<8x128xf32>
    %359 = arith.maximumf %353, %358 : vector<8x128xf32>
    %cst_170 = arith.constant dense<0x7F800000> : vector<8xf32>
    %360 = vector.multi_reduction <minimumf>, %356, %cst_170 [1] : vector<8x128xf32> to vector<8xf32>
    %361 = vector.shape_cast %360 : vector<8xf32> to vector<8x1xf32>
    %cst_171 = arith.constant dense<0xFF800000> : vector<8xf32>
    %362 = vector.multi_reduction <maximumf>, %359, %cst_171 [1] : vector<8x128xf32> to vector<8xf32>
    %363 = vector.shape_cast %362 : vector<8xf32> to vector<8x1xf32>
    %c5_i32 = arith.constant 5 : i32
    %364 = vector.broadcast %c5_i32 : i32 to vector<8x128xi32>
    %365 = arith.cmpi eq, %0, %364 : vector<8x128xi32>
    %366 = arith.subf %361, %363 : vector<8x1xf32>
    %367 = vector.shape_cast %366 : vector<8x1xf32> to vector<8x1xf32>
    %368 = vector.broadcast %367 : vector<8x1xf32> to vector<8x128xf32>
    %369 = arith.select %365, %368, %319 : vector<8x128xi1>, vector<8x128xf32>
    %c21_i32 = arith.constant 21 : i32
    %370 = vector.broadcast %c21_i32 : i32 to vector<8x128xi32>
    %371 = arith.cmpi eq, %0, %370 : vector<8x128xi32>
    %372 = vector.shape_cast %361 : vector<8x1xf32> to vector<8x1xf32>
    %373 = vector.broadcast %372 : vector<8x1xf32> to vector<8x128xf32>
    %374 = arith.select %371, %373, %369 : vector<8x128xi1>, vector<8x128xf32>
    %c37_i32 = arith.constant 37 : i32
    %375 = vector.broadcast %c37_i32 : i32 to vector<8x128xi32>
    %376 = arith.cmpi eq, %0, %375 : vector<8x128xi32>
    %377 = vector.shape_cast %363 : vector<8x1xf32> to vector<8x1xf32>
    %378 = vector.broadcast %377 : vector<8x1xf32> to vector<8x128xf32>
    %379 = arith.select %376, %378, %374 : vector<8x128xi1>, vector<8x128xf32>
    %c48 = arith.constant 48 : index
    %c0_172 = arith.constant 0 : index
    %380 = vector.load %arg2[%c48, %c0_172] : memref<160x896xf32, #tpu.memory_space<vmem>>, vector<8x128xf32>
    %381 = arith.subf %6, %380 : vector<8x128xf32>
    %c128_173 = arith.constant 128 : index
    %c0_174 = arith.constant 0 : index
    %382 = vector.load %arg2[%c128_173, %c0_174] : memref<160x896xf32, #tpu.memory_space<vmem>>, vector<8x128xf32>
    %383 = arith.addf %6, %382 : vector<8x128xf32>
    %c48_175 = arith.constant 48 : index
    %c128_176 = arith.constant 128 : index
    %384 = vector.load %arg2[%c48_175, %c128_176] : memref<160x896xf32, #tpu.memory_space<vmem>>, vector<8x128xf32>
    %385 = arith.subf %8, %384 : vector<8x128xf32>
    %386 = arith.minimumf %381, %385 : vector<8x128xf32>
    %c128_177 = arith.constant 128 : index
    %c128_178 = arith.constant 128 : index
    %387 = vector.load %arg2[%c128_177, %c128_178] : memref<160x896xf32, #tpu.memory_space<vmem>>, vector<8x128xf32>
    %388 = arith.addf %8, %387 : vector<8x128xf32>
    %389 = arith.maximumf %383, %388 : vector<8x128xf32>
    %c48_179 = arith.constant 48 : index
    %c256_180 = arith.constant 256 : index
    %390 = vector.load %arg2[%c48_179, %c256_180] : memref<160x896xf32, #tpu.memory_space<vmem>>, vector<8x128xf32>
    %391 = arith.subf %10, %390 : vector<8x128xf32>
    %392 = arith.minimumf %386, %391 : vector<8x128xf32>
    %c128_181 = arith.constant 128 : index
    %c256_182 = arith.constant 256 : index
    %393 = vector.load %arg2[%c128_181, %c256_182] : memref<160x896xf32, #tpu.memory_space<vmem>>, vector<8x128xf32>
    %394 = arith.addf %10, %393 : vector<8x128xf32>
    %395 = arith.maximumf %389, %394 : vector<8x128xf32>
    %c48_183 = arith.constant 48 : index
    %c384_184 = arith.constant 384 : index
    %396 = vector.load %arg2[%c48_183, %c384_184] : memref<160x896xf32, #tpu.memory_space<vmem>>, vector<8x128xf32>
    %397 = arith.subf %12, %396 : vector<8x128xf32>
    %398 = arith.minimumf %392, %397 : vector<8x128xf32>
    %c128_185 = arith.constant 128 : index
    %c384_186 = arith.constant 384 : index
    %399 = vector.load %arg2[%c128_185, %c384_186] : memref<160x896xf32, #tpu.memory_space<vmem>>, vector<8x128xf32>
    %400 = arith.addf %12, %399 : vector<8x128xf32>
    %401 = arith.maximumf %395, %400 : vector<8x128xf32>
    %c48_187 = arith.constant 48 : index
    %c512_188 = arith.constant 512 : index
    %402 = vector.load %arg2[%c48_187, %c512_188] : memref<160x896xf32, #tpu.memory_space<vmem>>, vector<8x128xf32>
    %403 = arith.subf %14, %402 : vector<8x128xf32>
    %404 = arith.minimumf %398, %403 : vector<8x128xf32>
    %c128_189 = arith.constant 128 : index
    %c512_190 = arith.constant 512 : index
    %405 = vector.load %arg2[%c128_189, %c512_190] : memref<160x896xf32, #tpu.memory_space<vmem>>, vector<8x128xf32>
    %406 = arith.addf %14, %405 : vector<8x128xf32>
    %407 = arith.maximumf %401, %406 : vector<8x128xf32>
    %c48_191 = arith.constant 48 : index
    %c640_192 = arith.constant 640 : index
    %408 = vector.load %arg2[%c48_191, %c640_192] : memref<160x896xf32, #tpu.memory_space<vmem>>, vector<8x128xf32>
    %409 = arith.subf %16, %408 : vector<8x128xf32>
    %410 = arith.minimumf %404, %409 : vector<8x128xf32>
    %c128_193 = arith.constant 128 : index
    %c640_194 = arith.constant 640 : index
    %411 = vector.load %arg2[%c128_193, %c640_194] : memref<160x896xf32, #tpu.memory_space<vmem>>, vector<8x128xf32>
    %412 = arith.addf %16, %411 : vector<8x128xf32>
    %413 = arith.maximumf %407, %412 : vector<8x128xf32>
    %c48_195 = arith.constant 48 : index
    %c768_196 = arith.constant 768 : index
    %414 = vector.load %arg2[%c48_195, %c768_196] : memref<160x896xf32, #tpu.memory_space<vmem>>, vector<8x128xf32>
    %415 = arith.subf %18, %414 : vector<8x128xf32>
    %416 = arith.minimumf %410, %415 : vector<8x128xf32>
    %c128_197 = arith.constant 128 : index
    %c768_198 = arith.constant 768 : index
    %417 = vector.load %arg2[%c128_197, %c768_198] : memref<160x896xf32, #tpu.memory_space<vmem>>, vector<8x128xf32>
    %418 = arith.addf %18, %417 : vector<8x128xf32>
    %419 = arith.maximumf %413, %418 : vector<8x128xf32>
    %cst_199 = arith.constant dense<0x7F800000> : vector<8xf32>
    %420 = vector.multi_reduction <minimumf>, %416, %cst_199 [1] : vector<8x128xf32> to vector<8xf32>
    %421 = vector.shape_cast %420 : vector<8xf32> to vector<8x1xf32>
    %cst_200 = arith.constant dense<0xFF800000> : vector<8xf32>
    %422 = vector.multi_reduction <maximumf>, %419, %cst_200 [1] : vector<8x128xf32> to vector<8xf32>
    %423 = vector.shape_cast %422 : vector<8xf32> to vector<8x1xf32>
    %c6_i32 = arith.constant 6 : i32
    %424 = vector.broadcast %c6_i32 : i32 to vector<8x128xi32>
    %425 = arith.cmpi eq, %0, %424 : vector<8x128xi32>
    %426 = arith.subf %421, %423 : vector<8x1xf32>
    %427 = vector.shape_cast %426 : vector<8x1xf32> to vector<8x1xf32>
    %428 = vector.broadcast %427 : vector<8x1xf32> to vector<8x128xf32>
    %429 = arith.select %425, %428, %379 : vector<8x128xi1>, vector<8x128xf32>
    %c22_i32 = arith.constant 22 : i32
    %430 = vector.broadcast %c22_i32 : i32 to vector<8x128xi32>
    %431 = arith.cmpi eq, %0, %430 : vector<8x128xi32>
    %432 = vector.shape_cast %421 : vector<8x1xf32> to vector<8x1xf32>
    %433 = vector.broadcast %432 : vector<8x1xf32> to vector<8x128xf32>
    %434 = arith.select %431, %433, %429 : vector<8x128xi1>, vector<8x128xf32>
    %c38_i32 = arith.constant 38 : i32
    %435 = vector.broadcast %c38_i32 : i32 to vector<8x128xi32>
    %436 = arith.cmpi eq, %0, %435 : vector<8x128xi32>
    %437 = vector.shape_cast %423 : vector<8x1xf32> to vector<8x1xf32>
    %438 = vector.broadcast %437 : vector<8x1xf32> to vector<8x128xf32>
    %439 = arith.select %436, %438, %434 : vector<8x128xi1>, vector<8x128xf32>
    %c56 = arith.constant 56 : index
    %c0_201 = arith.constant 0 : index
    %440 = vector.load %arg2[%c56, %c0_201] : memref<160x896xf32, #tpu.memory_space<vmem>>, vector<8x128xf32>
    %441 = arith.subf %6, %440 : vector<8x128xf32>
    %c136 = arith.constant 136 : index
    %c0_202 = arith.constant 0 : index
    %442 = vector.load %arg2[%c136, %c0_202] : memref<160x896xf32, #tpu.memory_space<vmem>>, vector<8x128xf32>
    %443 = arith.addf %6, %442 : vector<8x128xf32>
    %c56_203 = arith.constant 56 : index
    %c128_204 = arith.constant 128 : index
    %444 = vector.load %arg2[%c56_203, %c128_204] : memref<160x896xf32, #tpu.memory_space<vmem>>, vector<8x128xf32>
    %445 = arith.subf %8, %444 : vector<8x128xf32>
    %446 = arith.minimumf %441, %445 : vector<8x128xf32>
    %c136_205 = arith.constant 136 : index
    %c128_206 = arith.constant 128 : index
    %447 = vector.load %arg2[%c136_205, %c128_206] : memref<160x896xf32, #tpu.memory_space<vmem>>, vector<8x128xf32>
    %448 = arith.addf %8, %447 : vector<8x128xf32>
    %449 = arith.maximumf %443, %448 : vector<8x128xf32>
    %c56_207 = arith.constant 56 : index
    %c256_208 = arith.constant 256 : index
    %450 = vector.load %arg2[%c56_207, %c256_208] : memref<160x896xf32, #tpu.memory_space<vmem>>, vector<8x128xf32>
    %451 = arith.subf %10, %450 : vector<8x128xf32>
    %452 = arith.minimumf %446, %451 : vector<8x128xf32>
    %c136_209 = arith.constant 136 : index
    %c256_210 = arith.constant 256 : index
    %453 = vector.load %arg2[%c136_209, %c256_210] : memref<160x896xf32, #tpu.memory_space<vmem>>, vector<8x128xf32>
    %454 = arith.addf %10, %453 : vector<8x128xf32>
    %455 = arith.maximumf %449, %454 : vector<8x128xf32>
    %c56_211 = arith.constant 56 : index
    %c384_212 = arith.constant 384 : index
    %456 = vector.load %arg2[%c56_211, %c384_212] : memref<160x896xf32, #tpu.memory_space<vmem>>, vector<8x128xf32>
    %457 = arith.subf %12, %456 : vector<8x128xf32>
    %458 = arith.minimumf %452, %457 : vector<8x128xf32>
    %c136_213 = arith.constant 136 : index
    %c384_214 = arith.constant 384 : index
    %459 = vector.load %arg2[%c136_213, %c384_214] : memref<160x896xf32, #tpu.memory_space<vmem>>, vector<8x128xf32>
    %460 = arith.addf %12, %459 : vector<8x128xf32>
    %461 = arith.maximumf %455, %460 : vector<8x128xf32>
    %c56_215 = arith.constant 56 : index
    %c512_216 = arith.constant 512 : index
    %462 = vector.load %arg2[%c56_215, %c512_216] : memref<160x896xf32, #tpu.memory_space<vmem>>, vector<8x128xf32>
    %463 = arith.subf %14, %462 : vector<8x128xf32>
    %464 = arith.minimumf %458, %463 : vector<8x128xf32>
    %c136_217 = arith.constant 136 : index
    %c512_218 = arith.constant 512 : index
    %465 = vector.load %arg2[%c136_217, %c512_218] : memref<160x896xf32, #tpu.memory_space<vmem>>, vector<8x128xf32>
    %466 = arith.addf %14, %465 : vector<8x128xf32>
    %467 = arith.maximumf %461, %466 : vector<8x128xf32>
    %c56_219 = arith.constant 56 : index
    %c640_220 = arith.constant 640 : index
    %468 = vector.load %arg2[%c56_219, %c640_220] : memref<160x896xf32, #tpu.memory_space<vmem>>, vector<8x128xf32>
    %469 = arith.subf %16, %468 : vector<8x128xf32>
    %470 = arith.minimumf %464, %469 : vector<8x128xf32>
    %c136_221 = arith.constant 136 : index
    %c640_222 = arith.constant 640 : index
    %471 = vector.load %arg2[%c136_221, %c640_222] : memref<160x896xf32, #tpu.memory_space<vmem>>, vector<8x128xf32>
    %472 = arith.addf %16, %471 : vector<8x128xf32>
    %473 = arith.maximumf %467, %472 : vector<8x128xf32>
    %c56_223 = arith.constant 56 : index
    %c768_224 = arith.constant 768 : index
    %474 = vector.load %arg2[%c56_223, %c768_224] : memref<160x896xf32, #tpu.memory_space<vmem>>, vector<8x128xf32>
    %475 = arith.subf %18, %474 : vector<8x128xf32>
    %476 = arith.minimumf %470, %475 : vector<8x128xf32>
    %c136_225 = arith.constant 136 : index
    %c768_226 = arith.constant 768 : index
    %477 = vector.load %arg2[%c136_225, %c768_226] : memref<160x896xf32, #tpu.memory_space<vmem>>, vector<8x128xf32>
    %478 = arith.addf %18, %477 : vector<8x128xf32>
    %479 = arith.maximumf %473, %478 : vector<8x128xf32>
    %cst_227 = arith.constant dense<0x7F800000> : vector<8xf32>
    %480 = vector.multi_reduction <minimumf>, %476, %cst_227 [1] : vector<8x128xf32> to vector<8xf32>
    %481 = vector.shape_cast %480 : vector<8xf32> to vector<8x1xf32>
    %cst_228 = arith.constant dense<0xFF800000> : vector<8xf32>
    %482 = vector.multi_reduction <maximumf>, %479, %cst_228 [1] : vector<8x128xf32> to vector<8xf32>
    %483 = vector.shape_cast %482 : vector<8xf32> to vector<8x1xf32>
    %c7_i32 = arith.constant 7 : i32
    %484 = vector.broadcast %c7_i32 : i32 to vector<8x128xi32>
    %485 = arith.cmpi eq, %0, %484 : vector<8x128xi32>
    %486 = arith.subf %481, %483 : vector<8x1xf32>
    %487 = vector.shape_cast %486 : vector<8x1xf32> to vector<8x1xf32>
    %488 = vector.broadcast %487 : vector<8x1xf32> to vector<8x128xf32>
    %489 = arith.select %485, %488, %439 : vector<8x128xi1>, vector<8x128xf32>
    %c23_i32 = arith.constant 23 : i32
    %490 = vector.broadcast %c23_i32 : i32 to vector<8x128xi32>
    %491 = arith.cmpi eq, %0, %490 : vector<8x128xi32>
    %492 = vector.shape_cast %481 : vector<8x1xf32> to vector<8x1xf32>
    %493 = vector.broadcast %492 : vector<8x1xf32> to vector<8x128xf32>
    %494 = arith.select %491, %493, %489 : vector<8x128xi1>, vector<8x128xf32>
    %c39_i32 = arith.constant 39 : i32
    %495 = vector.broadcast %c39_i32 : i32 to vector<8x128xi32>
    %496 = arith.cmpi eq, %0, %495 : vector<8x128xi32>
    %497 = vector.shape_cast %483 : vector<8x1xf32> to vector<8x1xf32>
    %498 = vector.broadcast %497 : vector<8x1xf32> to vector<8x128xf32>
    %499 = arith.select %496, %498, %494 : vector<8x128xi1>, vector<8x128xf32>
    %c64 = arith.constant 64 : index
    %c0_229 = arith.constant 0 : index
    %500 = vector.load %arg2[%c64, %c0_229] : memref<160x896xf32, #tpu.memory_space<vmem>>, vector<8x128xf32>
    %501 = arith.subf %6, %500 : vector<8x128xf32>
    %c144 = arith.constant 144 : index
    %c0_230 = arith.constant 0 : index
    %502 = vector.load %arg2[%c144, %c0_230] : memref<160x896xf32, #tpu.memory_space<vmem>>, vector<8x128xf32>
    %503 = arith.addf %6, %502 : vector<8x128xf32>
    %c64_231 = arith.constant 64 : index
    %c128_232 = arith.constant 128 : index
    %504 = vector.load %arg2[%c64_231, %c128_232] : memref<160x896xf32, #tpu.memory_space<vmem>>, vector<8x128xf32>
    %505 = arith.subf %8, %504 : vector<8x128xf32>
    %506 = arith.minimumf %501, %505 : vector<8x128xf32>
    %c144_233 = arith.constant 144 : index
    %c128_234 = arith.constant 128 : index
    %507 = vector.load %arg2[%c144_233, %c128_234] : memref<160x896xf32, #tpu.memory_space<vmem>>, vector<8x128xf32>
    %508 = arith.addf %8, %507 : vector<8x128xf32>
    %509 = arith.maximumf %503, %508 : vector<8x128xf32>
    %c64_235 = arith.constant 64 : index
    %c256_236 = arith.constant 256 : index
    %510 = vector.load %arg2[%c64_235, %c256_236] : memref<160x896xf32, #tpu.memory_space<vmem>>, vector<8x128xf32>
    %511 = arith.subf %10, %510 : vector<8x128xf32>
    %512 = arith.minimumf %506, %511 : vector<8x128xf32>
    %c144_237 = arith.constant 144 : index
    %c256_238 = arith.constant 256 : index
    %513 = vector.load %arg2[%c144_237, %c256_238] : memref<160x896xf32, #tpu.memory_space<vmem>>, vector<8x128xf32>
    %514 = arith.addf %10, %513 : vector<8x128xf32>
    %515 = arith.maximumf %509, %514 : vector<8x128xf32>
    %c64_239 = arith.constant 64 : index
    %c384_240 = arith.constant 384 : index
    %516 = vector.load %arg2[%c64_239, %c384_240] : memref<160x896xf32, #tpu.memory_space<vmem>>, vector<8x128xf32>
    %517 = arith.subf %12, %516 : vector<8x128xf32>
    %518 = arith.minimumf %512, %517 : vector<8x128xf32>
    %c144_241 = arith.constant 144 : index
    %c384_242 = arith.constant 384 : index
    %519 = vector.load %arg2[%c144_241, %c384_242] : memref<160x896xf32, #tpu.memory_space<vmem>>, vector<8x128xf32>
    %520 = arith.addf %12, %519 : vector<8x128xf32>
    %521 = arith.maximumf %515, %520 : vector<8x128xf32>
    %c64_243 = arith.constant 64 : index
    %c512_244 = arith.constant 512 : index
    %522 = vector.load %arg2[%c64_243, %c512_244] : memref<160x896xf32, #tpu.memory_space<vmem>>, vector<8x128xf32>
    %523 = arith.subf %14, %522 : vector<8x128xf32>
    %524 = arith.minimumf %518, %523 : vector<8x128xf32>
    %c144_245 = arith.constant 144 : index
    %c512_246 = arith.constant 512 : index
    %525 = vector.load %arg2[%c144_245, %c512_246] : memref<160x896xf32, #tpu.memory_space<vmem>>, vector<8x128xf32>
    %526 = arith.addf %14, %525 : vector<8x128xf32>
    %527 = arith.maximumf %521, %526 : vector<8x128xf32>
    %c64_247 = arith.constant 64 : index
    %c640_248 = arith.constant 640 : index
    %528 = vector.load %arg2[%c64_247, %c640_248] : memref<160x896xf32, #tpu.memory_space<vmem>>, vector<8x128xf32>
    %529 = arith.subf %16, %528 : vector<8x128xf32>
    %530 = arith.minimumf %524, %529 : vector<8x128xf32>
    %c144_249 = arith.constant 144 : index
    %c640_250 = arith.constant 640 : index
    %531 = vector.load %arg2[%c144_249, %c640_250] : memref<160x896xf32, #tpu.memory_space<vmem>>, vector<8x128xf32>
    %532 = arith.addf %16, %531 : vector<8x128xf32>
    %533 = arith.maximumf %527, %532 : vector<8x128xf32>
    %c64_251 = arith.constant 64 : index
    %c768_252 = arith.constant 768 : index
    %534 = vector.load %arg2[%c64_251, %c768_252] : memref<160x896xf32, #tpu.memory_space<vmem>>, vector<8x128xf32>
    %535 = arith.subf %18, %534 : vector<8x128xf32>
    %536 = arith.minimumf %530, %535 : vector<8x128xf32>
    %c144_253 = arith.constant 144 : index
    %c768_254 = arith.constant 768 : index
    %537 = vector.load %arg2[%c144_253, %c768_254] : memref<160x896xf32, #tpu.memory_space<vmem>>, vector<8x128xf32>
    %538 = arith.addf %18, %537 : vector<8x128xf32>
    %539 = arith.maximumf %533, %538 : vector<8x128xf32>
    %cst_255 = arith.constant dense<0x7F800000> : vector<8xf32>
    %540 = vector.multi_reduction <minimumf>, %536, %cst_255 [1] : vector<8x128xf32> to vector<8xf32>
    %541 = vector.shape_cast %540 : vector<8xf32> to vector<8x1xf32>
    %cst_256 = arith.constant dense<0xFF800000> : vector<8xf32>
    %542 = vector.multi_reduction <maximumf>, %539, %cst_256 [1] : vector<8x128xf32> to vector<8xf32>
    %543 = vector.shape_cast %542 : vector<8xf32> to vector<8x1xf32>
    %c8_i32_257 = arith.constant 8 : i32
    %544 = vector.broadcast %c8_i32_257 : i32 to vector<8x128xi32>
    %545 = arith.cmpi eq, %0, %544 : vector<8x128xi32>
    %546 = arith.subf %541, %543 : vector<8x1xf32>
    %547 = vector.shape_cast %546 : vector<8x1xf32> to vector<8x1xf32>
    %548 = vector.broadcast %547 : vector<8x1xf32> to vector<8x128xf32>
    %549 = arith.select %545, %548, %499 : vector<8x128xi1>, vector<8x128xf32>
    %c24_i32 = arith.constant 24 : i32
    %550 = vector.broadcast %c24_i32 : i32 to vector<8x128xi32>
    %551 = arith.cmpi eq, %0, %550 : vector<8x128xi32>
    %552 = vector.shape_cast %541 : vector<8x1xf32> to vector<8x1xf32>
    %553 = vector.broadcast %552 : vector<8x1xf32> to vector<8x128xf32>
    %554 = arith.select %551, %553, %549 : vector<8x128xi1>, vector<8x128xf32>
    %c40_i32 = arith.constant 40 : i32
    %555 = vector.broadcast %c40_i32 : i32 to vector<8x128xi32>
    %556 = arith.cmpi eq, %0, %555 : vector<8x128xi32>
    %557 = vector.shape_cast %543 : vector<8x1xf32> to vector<8x1xf32>
    %558 = vector.broadcast %557 : vector<8x1xf32> to vector<8x128xf32>
    %559 = arith.select %556, %558, %554 : vector<8x128xi1>, vector<8x128xf32>
    %c72 = arith.constant 72 : index
    %c0_258 = arith.constant 0 : index
    %560 = vector.load %arg2[%c72, %c0_258] : memref<160x896xf32, #tpu.memory_space<vmem>>, vector<8x128xf32>
    %561 = arith.subf %6, %560 : vector<8x128xf32>
    %c152 = arith.constant 152 : index
    %c0_259 = arith.constant 0 : index
    %562 = vector.load %arg2[%c152, %c0_259] : memref<160x896xf32, #tpu.memory_space<vmem>>, vector<8x128xf32>
    %563 = arith.addf %6, %562 : vector<8x128xf32>
    %c72_260 = arith.constant 72 : index
    %c128_261 = arith.constant 128 : index
    %564 = vector.load %arg2[%c72_260, %c128_261] : memref<160x896xf32, #tpu.memory_space<vmem>>, vector<8x128xf32>
    %565 = arith.subf %8, %564 : vector<8x128xf32>
    %566 = arith.minimumf %561, %565 : vector<8x128xf32>
    %c152_262 = arith.constant 152 : index
    %c128_263 = arith.constant 128 : index
    %567 = vector.load %arg2[%c152_262, %c128_263] : memref<160x896xf32, #tpu.memory_space<vmem>>, vector<8x128xf32>
    %568 = arith.addf %8, %567 : vector<8x128xf32>
    %569 = arith.maximumf %563, %568 : vector<8x128xf32>
    %c72_264 = arith.constant 72 : index
    %c256_265 = arith.constant 256 : index
    %570 = vector.load %arg2[%c72_264, %c256_265] : memref<160x896xf32, #tpu.memory_space<vmem>>, vector<8x128xf32>
    %571 = arith.subf %10, %570 : vector<8x128xf32>
    %572 = arith.minimumf %566, %571 : vector<8x128xf32>
    %c152_266 = arith.constant 152 : index
    %c256_267 = arith.constant 256 : index
    %573 = vector.load %arg2[%c152_266, %c256_267] : memref<160x896xf32, #tpu.memory_space<vmem>>, vector<8x128xf32>
    %574 = arith.addf %10, %573 : vector<8x128xf32>
    %575 = arith.maximumf %569, %574 : vector<8x128xf32>
    %c72_268 = arith.constant 72 : index
    %c384_269 = arith.constant 384 : index
    %576 = vector.load %arg2[%c72_268, %c384_269] : memref<160x896xf32, #tpu.memory_space<vmem>>, vector<8x128xf32>
    %577 = arith.subf %12, %576 : vector<8x128xf32>
    %578 = arith.minimumf %572, %577 : vector<8x128xf32>
    %c152_270 = arith.constant 152 : index
    %c384_271 = arith.constant 384 : index
    %579 = vector.load %arg2[%c152_270, %c384_271] : memref<160x896xf32, #tpu.memory_space<vmem>>, vector<8x128xf32>
    %580 = arith.addf %12, %579 : vector<8x128xf32>
    %581 = arith.maximumf %575, %580 : vector<8x128xf32>
    %c72_272 = arith.constant 72 : index
    %c512_273 = arith.constant 512 : index
    %582 = vector.load %arg2[%c72_272, %c512_273] : memref<160x896xf32, #tpu.memory_space<vmem>>, vector<8x128xf32>
    %583 = arith.subf %14, %582 : vector<8x128xf32>
    %584 = arith.minimumf %578, %583 : vector<8x128xf32>
    %c152_274 = arith.constant 152 : index
    %c512_275 = arith.constant 512 : index
    %585 = vector.load %arg2[%c152_274, %c512_275] : memref<160x896xf32, #tpu.memory_space<vmem>>, vector<8x128xf32>
    %586 = arith.addf %14, %585 : vector<8x128xf32>
    %587 = arith.maximumf %581, %586 : vector<8x128xf32>
    %c72_276 = arith.constant 72 : index
    %c640_277 = arith.constant 640 : index
    %588 = vector.load %arg2[%c72_276, %c640_277] : memref<160x896xf32, #tpu.memory_space<vmem>>, vector<8x128xf32>
    %589 = arith.subf %16, %588 : vector<8x128xf32>
    %590 = arith.minimumf %584, %589 : vector<8x128xf32>
    %c152_278 = arith.constant 152 : index
    %c640_279 = arith.constant 640 : index
    %591 = vector.load %arg2[%c152_278, %c640_279] : memref<160x896xf32, #tpu.memory_space<vmem>>, vector<8x128xf32>
    %592 = arith.addf %16, %591 : vector<8x128xf32>
    %593 = arith.maximumf %587, %592 : vector<8x128xf32>
    %c72_280 = arith.constant 72 : index
    %c768_281 = arith.constant 768 : index
    %594 = vector.load %arg2[%c72_280, %c768_281] : memref<160x896xf32, #tpu.memory_space<vmem>>, vector<8x128xf32>
    %595 = arith.subf %18, %594 : vector<8x128xf32>
    %596 = arith.minimumf %590, %595 : vector<8x128xf32>
    %c152_282 = arith.constant 152 : index
    %c768_283 = arith.constant 768 : index
    %597 = vector.load %arg2[%c152_282, %c768_283] : memref<160x896xf32, #tpu.memory_space<vmem>>, vector<8x128xf32>
    %598 = arith.addf %18, %597 : vector<8x128xf32>
    %599 = arith.maximumf %593, %598 : vector<8x128xf32>
    %cst_284 = arith.constant dense<0x7F800000> : vector<8xf32>
    %600 = vector.multi_reduction <minimumf>, %596, %cst_284 [1] : vector<8x128xf32> to vector<8xf32>
    %601 = vector.shape_cast %600 : vector<8xf32> to vector<8x1xf32>
    %cst_285 = arith.constant dense<0xFF800000> : vector<8xf32>
    %602 = vector.multi_reduction <maximumf>, %599, %cst_285 [1] : vector<8x128xf32> to vector<8xf32>
    %603 = vector.shape_cast %602 : vector<8xf32> to vector<8x1xf32>
    %c9_i32 = arith.constant 9 : i32
    %604 = vector.broadcast %c9_i32 : i32 to vector<8x128xi32>
    %605 = arith.cmpi eq, %0, %604 : vector<8x128xi32>
    %606 = arith.subf %601, %603 : vector<8x1xf32>
    %607 = vector.shape_cast %606 : vector<8x1xf32> to vector<8x1xf32>
    %608 = vector.broadcast %607 : vector<8x1xf32> to vector<8x128xf32>
    %609 = arith.select %605, %608, %559 : vector<8x128xi1>, vector<8x128xf32>
    %c25_i32 = arith.constant 25 : i32
    %610 = vector.broadcast %c25_i32 : i32 to vector<8x128xi32>
    %611 = arith.cmpi eq, %0, %610 : vector<8x128xi32>
    %612 = vector.shape_cast %601 : vector<8x1xf32> to vector<8x1xf32>
    %613 = vector.broadcast %612 : vector<8x1xf32> to vector<8x128xf32>
    %614 = arith.select %611, %613, %609 : vector<8x128xi1>, vector<8x128xf32>
    %c41_i32 = arith.constant 41 : i32
    %615 = vector.broadcast %c41_i32 : i32 to vector<8x128xi32>
    %616 = arith.cmpi eq, %0, %615 : vector<8x128xi32>
    %617 = vector.shape_cast %603 : vector<8x1xf32> to vector<8x1xf32>
    %618 = vector.broadcast %617 : vector<8x1xf32> to vector<8x128xf32>
    %619 = arith.select %616, %618, %614 : vector<8x128xi1>, vector<8x128xf32>
    %620 = arith.index_cast %4 : i32 to index
    %c0_286 = arith.constant 0 : index
    %621 = vector.load %arg3[%620, %c0_286] : memref<8x128xf32, #tpu.memory_space<vmem>>, vector<8x128xf32>
    tpu.vector_store %arg3[%620, %c0_286], %619 {strides = array<i32>} : memref<8x128xf32, #tpu.memory_space<vmem>>, vector<8x128xf32>,
    %c1_i32_287 = arith.constant 1 : i32
    return
  }
  func.func @transform_0(%arg0: i32) -> (i32, i32) {
    %c0_i32 = arith.constant 0 : i32
    %c0_i32_0 = arith.constant 0 : i32
    return %arg0, %c0_i32 : i32, i32
  }
  func.func @transform_1(%arg0: i32) -> (i32, i32) {
    %c0_i32 = arith.constant 0 : i32
    %c0_i32_0 = arith.constant 0 : i32
    %c0_i32_1 = arith.constant 0 : i32
    return %c0_i32, %c0_i32_0 : i32, i32
  }
  func.func @transform_2(%arg0: i32) -> (i32, i32) {
    %c0_i32 = arith.constant 0 : i32
    %c0_i32_0 = arith.constant 0 : i32
    return %arg0, %c0_i32 : i32, i32
  }
}

</mosaic_0001>

<bundles_post_ra>
// kernel: morphnet_forward.1
= control target key start
LH: loop header
LB: loop body
LE: loop exit
PB: predicated region body
PF: predicated region fallthrough
CT: control target
= control target key end

     0   :  { %s1195_s0 = inlined_call_operand.vmem [shape: f32[8,896], index: 0, kind: input, shape index: {}]   ;;  %s1196_s1 = inlined_call_operand.vmem [shape: f32[160,896], index: 1, kind: input, shape index: {}]   ;;  %s1197_s2 = inlined_call_operand.vmem [shape: f32[8,128], index: 2, kind: output, shape index: {}]  }
   0x1   :  { %v556_v0 = vld [vmem:[%s1195_s0] sm:$0xff]  ;;  %v561_v1 = vld [vmem:[%s1195_s0 + $0x8] sm:$0xff]  ;;  %v566_v2 = vld [vmem:[%s1195_s0 + $0x10] sm:$0xff] }
   0x2   :  { %v571_v3 = vld [vmem:[%s1195_s0 + $0x18] sm:$0xff]  ;;  %v576_v4 = vld [vmem:[%s1195_s0 + $0x20] sm:$0xff]  ;;  %v581_v5 = vld [vmem:[%s1195_s0 + $0x28] sm:$0xff] }
   0x3   :  { %v586_v6 = vld [vmem:[%s1195_s0 + $0x30] sm:$0xff]  ;;  %v129_v8 = vld [vmem:[%s1196_s1 + $0x78] sm:$0xff]  ;;  %v135_v11 = vld [vmem:[%s1196_s1 + $0x80] sm:$0xff] }
   0x4   :  { %v125_v7 = vld [vmem:[%s1196_s1 + $0x70] sm:$0xff]  ;;  %v130_v10 = vsub.f32 %v561_v1, %v129_v8  ;;  %v141_v12 = vld [vmem:[%s1196_s1 + $0x88] sm:$0xff]  ;;  %v136_v14 = vsub.f32 %v566_v2, %v135_v11  ;;  %v153_v15 = vld [vmem:[%s1196_s1 + $0x98] sm:$0xff] }
   0x5   :  { %v126_v9 = vsub.f32 %v556_v0, %v125_v7  ;;  %v147_v13 = vld [vmem:[%s1196_s1 + $0x90] sm:$0xff]  ;;  %v612_v16 = vld [vmem:[%s1196_s1 + $0xa0] sm:$0xff]  ;;  %v74_v17 = vld [vmem:[%s1196_s1 + $0x38] sm:$0xff]  ;;  %v142_v19 = vsub.f32 %v571_v3, %v141_v12  ;;  %v154_v31 = vsub.f32 %v581_v5, %v153_v15 }
   0x6   :  { %v75_v20 = vsub.f32 %v556_v0, %v74_v17  ;;  %v78_v21 = vld [vmem:[%s1196_s1 + $0x40] sm:$0xff]  ;;  %v84_v22 = vld [vmem:[%s1196_s1 + $0x48] sm:$0xff]  ;;  %v90_v23 = vld [vmem:[%s1196_s1 + $0x50] sm:$0xff]  ;;  %v148_v24 = vsub.f32 %v576_v4, %v147_v13  ;;  %v160_v32 = vsub.f32 %v586_v6, %v612_v16 }
   0x7   :  { %v131_v18 = vmin.f32 %v126_v9, %v130_v10  ;;  %v79_v25 = vsub.f32 %v561_v1, %v78_v21  ;;  %v85_v26 = vsub.f32 %v566_v2, %v84_v22  ;;  %v96_v27 = vld [vmem:[%s1196_s1 + $0x58] sm:$0xff]  ;;  %v102_v28 = vld [vmem:[%s1196_s1 + $0x60] sm:$0xff]  ;;  %v640_v29 = vld [vmem:[%s1196_s1 + $0x68] sm:$0xff]  ;;  %v91_v33 = vsub.f32 %v571_v3, %v90_v23 }
   0x8   :  { %v23_v34 = vld [vmem:[%s1196_s1] sm:$0xff]  ;;  %v27_v35 = vld [vmem:[%s1196_s1 + $0x8] sm:$0xff]  ;;  %v33_v36 = vld [vmem:[%s1196_s1 + $0x10] sm:$0xff]  ;;  %v97_v45 = vsub.f32 %v576_v4, %v96_v27  ;;  %v103_v46 = vsub.f32 %v581_v5, %v102_v28  ;;  %v109_v47 = vsub.f32 %v586_v6, %v640_v29 }
   0x9   :  { %v137_v30 = vmin.f32 %v131_v18, %v136_v14  ;;  %v80_v37 = vmin.f32 %v75_v20, %v79_v25  ;;  %v24_v38 = vsub.f32 %v556_v0, %v23_v34  ;;  %v28_v39 = vsub.f32 %v561_v1, %v27_v35  ;;  %v39_v41 = vld [vmem:[%s1196_s1 + $0x18] sm:$0xff]  ;;  %v45_v42 = vld [vmem:[%s1196_s1 + $0x20] sm:$0xff]  ;;  %v51_v43 = vld [vmem:[%s1196_s1 + $0x28] sm:$0xff] }
   0xa   :  { %v34_v40 = vsub.f32 %v566_v2, %v33_v36  ;;  %v674_v48 = vld [vmem:[%s1196_s1 + $0x30] sm:$0xff]  ;;  %v127_v49 = vld [vmem:[%s1196_s1 + $0x2a0] sm:$0xff]  ;;  %v132_v50 = vld [vmem:[%s1196_s1 + $0x2a8] sm:$0xff]  ;;  %v40_v53 = vsub.f32 %v571_v3, %v39_v41  ;;  %v46_v58 = vsub.f32 %v576_v4, %v45_v42  ;;  %v52_v8 = vsub.f32 %v581_v5, %v51_v43 }
   0xb   :  { %v143_v44 = vmin.f32 %v137_v30, %v142_v19  ;;  %v86_v51 = vmin.f32 %v80_v37, %v85_v26  ;;  %v29_v52 = vmin.f32 %v24_v38, %v28_v39  ;;  %v128_v54 = vadd.f32 %v127_v49, %v556_v0  ;;  %v138_v55 = vld [vmem:[%s1196_s1 + $0x2b0] sm:$0xff]  ;;  %v144_v56 = vld [vmem:[%s1196_s1 + $0x2b8] sm:$0xff]  ;;  %v150_v61 = vld [vmem:[%s1196_s1 + $0x2c0] sm:$0xff] }
   0xc   :  { %v133_v59 = vadd.f32 %v132_v50, %v561_v1  ;;  %v139_v60 = vadd.f32 %v138_v55, %v566_v2  ;;  %v76_v62 = vld [vmem:[%s1196_s1 + $0x268] sm:$0xff]  ;;  %v58_v9 = vsub.f32 %v586_v6, %v674_v48  ;;  %v81_v11 = vld [vmem:[%s1196_s1 + $0x270] sm:$0xff]  ;;  %v87_v12 = vld [vmem:[%s1196_s1 + $0x278] sm:$0xff]  ;;  %v145_v15 = vadd.f32 %v144_v56, %v571_v3 }
   0xd   :  { %v149_v57 = vmin.f32 %v143_v44, %v148_v24  ;;  %v92_v63 = vmin.f32 %v86_v51, %v91_v33  ;;  %v35_v7 = vmin.f32 %v29_v52, %v34_v40  ;;  %v156_v10 = vld [vmem:[%s1196_s1 + $0x2c8] sm:$0xff]  ;;  %v77_v16 = vadd.f32 %v76_v62, %v556_v0  ;;  %v93_v17 = vld [vmem:[%s1196_s1 + $0x280] sm:$0xff]  ;;  %v25_v23 = vld [vmem:[%s1196_s1 + $0x230] sm:$0xff] }
   0xe   :  { %v134_v14 = vmax.f32 %v128_v54, %v133_v59  ;;  %v82_v20 = vadd.f32 %v81_v11, %v561_v1  ;;  %v88_v21 = vadd.f32 %v87_v12, %v566_v2  ;;  %v99_v22 = vld [vmem:[%s1196_s1 + $0x288] sm:$0xff]  ;;  %v30_v24 = vld [vmem:[%s1196_s1 + $0x238] sm:$0xff]  ;;  %v151_v27 = vadd.f32 %v150_v61, %v576_v4  ;;  %v36_v29 = vld [vmem:[%s1196_s1 + $0x240] sm:$0xff] }
   0xf   :  { %v155_v13 = vmin.f32 %v149_v57, %v154_v31  ;;  %v98_v18 = vmin.f32 %v92_v63, %v97_v45  ;;  %v41_v19 = vmin.f32 %v35_v7, %v40_v53  ;;  %v157_v28 = vadd.f32 %v156_v10, %v581_v5  ;;  %v162_v33 = vld [vmem:[%s1196_s1 + $0x2d0] sm:$0xff]  ;;  %v231_v48 = vld [vmem:[%s1196_s1 + $0xe8] sm:$0xff]  ;;  %v111_v51 = vld [vmem:[%s1196_s1 + $0x298] sm:$0xff] }
  0x10   :  { %v140_v26 = vmax.f32 %v134_v14, %v139_v60  ;;  %v83_v34 = vmax.f32 %v77_v16, %v82_v20  ;;  %v94_v35 = vadd.f32 %v93_v17, %v571_v3  ;;  %v100_v37 = vadd.f32 %v99_v22, %v576_v4  ;;  %v105_v38 = vld [vmem:[%s1196_s1 + $0x290] sm:$0xff]  ;;  %v54_v53 = vld [vmem:[%s1196_s1 + $0x258] sm:$0xff]  ;;  %v60_v62 = vld [vmem:[%s1196_s1 + $0x260] sm:$0xff] }
  0x11   :  { %v161_v25 = vmin.f32 %v155_v13, %v160_v32  ;;  %v104_v30 = vmin.f32 %v98_v18, %v103_v46  ;;  %v47_v31 = vmin.f32 %v41_v19, %v46_v58  ;;  %v42_v32 = vld [vmem:[%s1196_s1 + $0x248] sm:$0xff]  ;;  %v26_v39 = vadd.f32 %v25_v23, %v556_v0  ;;  %v48_v41 = vld [vmem:[%s1196_s1 + $0x250] sm:$0xff]  ;;  %v227_v46 = vld [vmem:[%s1196_s1 + $0xe0] sm:$0xff] }
  0x12   :  { %v146_v36 = vmax.f32 %v140_v26, %v145_v15  ;;  %v31_v40 = vadd.f32 %v30_v24, %v561_v1  ;;  %v89_v44 = vmax.f32 %v83_v34, %v88_v21  ;;  %v37_v45 = vadd.f32 %v36_v29, %v566_v2  ;;  %v237_v54 = vld [vmem:[%s1196_s1 + $0xf0] sm:$0xff]  ;;  %v243_v59 = vld [vmem:[%s1196_s1 + $0xf8] sm:$0xff]  ;;  %v249_v14 = vld [vmem:[%s1196_s1 + $0x100] sm:$0xff] }
  0x13   :  { %165 = vmin.xlane.f32.xlu2 %v161_v25  ;;  %v110_v42 = vmin.f32 %v104_v30, %v109_v47  ;;  %v53_v43 = vmin.f32 %v47_v31, %v52_v8  ;;  %v163_v50 = vadd.f32 %v162_v33, %v586_v6  ;;  %v43_v52 = vadd.f32 %v42_v32, %v571_v3  ;;  %v178_v8 = vld [vmem:[%s1196_s1 + $0x2d8] sm:$0xff]  ;;  %v189_v15 = vld [vmem:[%s1196_s1 + $0x2e8] sm:$0xff]  ;;  %v195_v21 = vld [vmem:[%s1196_s1 + $0x2f0] sm:$0xff] }
  0x14   :  { %v152_v49 = vmax.f32 %v146_v36, %v151_v27  ;;  %v32_v47 = vmax.f32 %v26_v39, %v31_v40  ;;  %v95_v56 = vmax.f32 %v89_v44, %v94_v35  ;;  %v106_v57 = vadd.f32 %v105_v38, %v581_v5  ;;  %v255_v20 = vld [vmem:[%s1196_s1 + $0x108] sm:$0xff]  ;;  %v261_v24 = vld [vmem:[%s1196_s1 + $0x110] sm:$0xff]  ;;  %v201_v33 = vld [vmem:[%s1196_s1 + $0x2f8] sm:$0xff] }
  0x15   :  { %114 = vmin.xlane.f32.xlu1 %v110_v42  ;;  %v59_v55 = vmin.f32 %v53_v43, %v58_v9  ;;  %v49_v58 = vadd.f32 %v48_v41, %v576_v4  ;;  %v228_v63 = vsub.f32 %v556_v0, %v227_v46  ;;  %v232_v7 = vsub.f32 %v561_v1, %v231_v48  ;;  %v183_v9 = vld [vmem:[%s1196_s1 + $0x2e0] sm:$0xff]  ;;  %v176_v27 = vld [vmem:[%s1196_s1 + $0xa8] sm:$0xff]  ;;  %v180_v34 = vld [vmem:[%s1196_s1 + $0xb0] sm:$0xff] }
  0x16   :  { %v158_v60 = vmax.f32 %v152_v49, %v157_v28  ;;  %v38_v61 = vmax.f32 %v32_v47, %v37_v45  ;;  %v101_v10 = vmax.f32 %v95_v56, %v100_v37  ;;  %v112_v11 = vadd.f32 %v111_v51, %v586_v6  ;;  %v186_v35 = vld [vmem:[%s1196_s1 + $0xb8] sm:$0xff]  ;;  %v207_v39 = vld [vmem:[%s1196_s1 + $0x300] sm:$0xff]  ;;  %v213_v40 = vld [vmem:[%s1196_s1 + $0x308] sm:$0xff] }
  0x17   :  { %63 = vmin.xlane.f32.xlu0 %v59_v55  ;;  %v55_v12 = vadd.f32 %v54_v53, %v581_v5  ;;  %v238_v13 = vsub.f32 %v566_v2, %v237_v54  ;;  %v233_v18 = vmin.f32 %v228_v63, %v232_v7  ;;  %v244_v19 = vsub.f32 %v571_v3, %v243_v59  ;;  %v192_v45 = vld [vmem:[%s1196_s1 + $0xc0] sm:$0xff]  ;;  %v280_v46 = vld [vmem:[%s1196_s1 + $0x348] sm:$0xff]  ;;  %v291_v53 = vld [vmem:[%s1196_s1 + $0x358] sm:$0xff] }
  0x18   :  { %v164_v16 = vmax.f32 %v158_v60, %v163_v50  ;;  %v44_v17 = vmax.f32 %v38_v61, %v43_v52  ;;  %v107_v22 = vmax.f32 %v101_v10, %v106_v57  ;;  %v61_v23 = vadd.f32 %v60_v62, %v586_v6  ;;  %v198_v47 = vld [vmem:[%s1196_s1 + $0xc8] sm:$0xff]  ;;  %v285_v52 = vld [vmem:[%s1196_s1 + $0x350] sm:$0xff]  ;;  %v854_v59 = vld [vmem:[%s1196_s1 + $0xd8] sm:$0xff] }
  0x19   :  { %v179_v25 = vadd.f32 %v178_v8, %v556_v0  ;;  %v184_v26 = vadd.f32 %v183_v9, %v561_v1  ;;  %v239_v29 = vmin.f32 %v233_v18, %v238_v13  ;;  %v250_v30 = vsub.f32 %v576_v4, %v249_v14  ;;  %v297_v7 = vld [vmem:[%s1196_s1 + $0x360] sm:$0xff]  ;;  %v278_v8 = vld [vmem:[%s1196_s1 + $0x118] sm:$0xff]  ;;  %v288_v14 = vld [vmem:[%s1196_s1 + $0x128] sm:$0xff] }
  0x1a   :  { %v50_v28 = vmax.f32 %v44_v17, %v49_v58  ;;  %v190_v31 = vadd.f32 %v189_v15, %v566_v2  ;;  %v113_v32 = vmax.f32 %v107_v22, %v112_v11  ;;  %v256_v36 = vsub.f32 %v581_v5, %v255_v20  ;;  %v204_v58 = vld [vmem:[%s1196_s1 + $0xd0] sm:$0xff]  ;;  %v282_v13 = vld [vmem:[%s1196_s1 + $0x120] sm:$0xff] }
  0x1b   :  { %167 = vmax.xlane.f32.xlu2 %v164_v16  ;;  %v185_v37 = vmax.f32 %v179_v25, %v184_v26  ;;  %v196_v38 = vadd.f32 %v195_v21, %v571_v3  ;;  %v245_v42 = vmin.f32 %v239_v29, %v244_v19  ;;  %v262_v43 = vsub.f32 %v586_v6, %v261_v24  ;;  %v303_v19 = vld [vmem:[%s1196_s1 + $0x368] sm:$0xff]  ;;  %v309_v20 = vld [vmem:[%s1196_s1 + $0x370] sm:$0xff]  ;;  %v315_v21 = vld [vmem:[%s1196_s1 + $0x378] sm:$0xff] }
  0x1c   :  { %v56_v41 = vmax.f32 %v50_v28, %v55_v12  ;;  %v177_v44 = vsub.f32 %v556_v0, %v176_v27  ;;  %v202_v49 = vadd.f32 %v201_v33, %v576_v4  ;;  %v181_v50 = vsub.f32 %v561_v1, %v180_v34  ;;  %v294_v26 = vld [vmem:[%s1196_s1 + $0x130] sm:$0xff]  ;;  %v234_v33 = vld [vmem:[%s1196_s1 + $0x318] sm:$0xff]  ;;  %v240_v34 = vld [vmem:[%s1196_s1 + $0x320] sm:$0xff] }
  0x1d   :  { %116 = vmax.xlane.f32.xlu1 %v113_v32  ;;  %v191_v48 = vmax.f32 %v185_v37, %v190_v31  ;;  %v187_v51 = vsub.f32 %v566_v2, %v186_v35  ;;  %v251_v55 = vmin.f32 %v245_v42, %v250_v30  ;;  %v208_v56 = vadd.f32 %v207_v39, %v581_v5  ;;  %v229_v31 = vld [vmem:[%s1196_s1 + $0x310] sm:$0xff]  ;;  %v306_v39 = vld [vmem:[%s1196_s1 + $0x140] sm:$0xff] }
  0x1e   :  { %v62_v54 = vmax.f32 %v56_v41, %v61_v23  ;;  %v214_v57 = vadd.f32 %v213_v40, %v586_v6  ;;  %v182_v61 = vmin.f32 %v177_v44, %v181_v50  ;;  %v193_v62 = vsub.f32 %v571_v3, %v192_v45  ;;  %v312_v44 = vld [vmem:[%s1196_s1 + $0x148] sm:$0xff] }
  0x1f   :  { %v197_v60 = vmax.f32 %v191_v48, %v196_v38  ;;  %v281_v63 = vadd.f32 %v280_v46, %v556_v0  ;;  %v257_v9 = vmin.f32 %v251_v55, %v256_v36  ;;  %v199_v10 = vsub.f32 %v576_v4, %v198_v47  ;;  %v300_v38 = vld [vmem:[%s1196_s1 + $0x138] sm:$0xff]  ;;  %v246_v45 = vld [vmem:[%s1196_s1 + $0x328] sm:$0xff]  ;;  %v384_v47 = vld [vmem:[%s1196_s1 + $0x190] sm:$0xff] }
  0x20   :  { %65 = vmax.xlane.f32.xlu0 %v62_v54  ;;  %v286_v11 = vadd.f32 %v285_v52, %v561_v1  ;;  %v292_v12 = vadd.f32 %v291_v53, %v566_v2  ;;  %v188_v16 = vmin.f32 %v182_v61, %v187_v51  ;;  %v205_v17 = vsub.f32 %v581_v5, %v204_v58  ;;  %v380_v51 = vld [vmem:[%s1196_s1 + $0x188] sm:$0xff] }
  0x21   :  { %v203_v15 = vmax.f32 %v197_v60, %v202_v49  ;;  %v211_v18 = vsub.f32 %v586_v6, %v854_v59  ;;  %v263_v22 = vmin.f32 %v257_v9, %v262_v43  ;;  %v298_v24 = vadd.f32 %v297_v7, %v571_v3 }
  0x22   :  { %v287_v23 = vmax.f32 %v281_v63, %v286_v11  ;;  %v279_v25 = vsub.f32 %v556_v0, %v278_v8  ;;  %v194_v28 = vmin.f32 %v188_v16, %v193_v62  ;;  %v283_v29 = vsub.f32 %v561_v1, %v282_v13  ;;  %v258_v62 = vld [vmem:[%s1196_s1 + $0x338] sm:$0xff]  ;;  %v396_v63 = vld [vmem:[%s1196_s1 + $0x1a0] sm:$0xff]  ;;  %v402_v11 = vld [vmem:[%s1196_s1 + $0x1a8] sm:$0xff] }
  0x23   :  { %v209_v27 = vmax.f32 %v203_v15, %v208_v56  ;;  %v289_v30 = vsub.f32 %v566_v2, %v288_v14  ;;  %267 = vmin.xlane.f32.xlu2 %v263_v22  ;;  %v304_v32 = vadd.f32 %v303_v19, %v576_v4  ;;  %v310_v36 = vadd.f32 %v309_v20, %v581_v5  ;;  %v252_v56 = vld [vmem:[%s1196_s1 + $0x330] sm:$0xff] }
  0x24   :  { %v293_v35 = vmax.f32 %v287_v23, %v292_v12  ;;  %v316_v37 = vadd.f32 %v315_v21, %v586_v6  ;;  %v200_v41 = vmin.f32 %v194_v28, %v199_v10  ;;  %v284_v42 = vmin.f32 %v279_v25, %v283_v29  ;;  %v331_v12 = vld [vmem:[%s1196_s1 + $0x380] sm:$0xff]  ;;  %v414_v25 = vld [vmem:[%s1196_s1 + $0x1b8] sm:$0xff] }
  0x25   :  { %v215_v40 = vmax.f32 %v209_v27, %v214_v57  ;;  %v295_v43 = vsub.f32 %v571_v3, %v294_v26  ;;  %v230_v48 = vadd.f32 %v229_v31, %v556_v0  ;;  %v235_v49 = vadd.f32 %v234_v33, %v561_v1  ;;  %v390_v57 = vld [vmem:[%s1196_s1 + $0x198] sm:$0xff]  ;;  %v264_v21 = vld [vmem:[%s1196_s1 + $0x340] sm:$0xff] }
  0x26   :  { %v299_v46 = vmax.f32 %v293_v35, %v298_v24  ;;  %v241_v50 = vadd.f32 %v240_v34, %v566_v2  ;;  %v206_v52 = vmin.f32 %v200_v41, %v205_v17  ;;  %v290_v53 = vmin.f32 %v284_v42, %v289_v30  ;;  %v336_v17 = vld [vmem:[%s1196_s1 + $0x388] sm:$0xff]  ;;  %v408_v24 = vld [vmem:[%s1196_s1 + $0x1b0] sm:$0xff]  ;;  %v348_v30 = vld [vmem:[%s1196_s1 + $0x398] sm:$0xff] }
  0x27   :  { %218 = vmax.xlane.f32.xlu1 %v215_v40  ;;  %v301_v54 = vsub.f32 %v576_v4, %v300_v38  ;;  %v307_v55 = vsub.f32 %v581_v5, %v306_v39  ;;  %v313_v59 = vsub.f32 %v586_v6, %v312_v44  ;;  %v236_v60 = vmax.f32 %v230_v48, %v235_v49  ;;  %v354_v42 = vld [vmem:[%s1196_s1 + $0x3a0] sm:$0xff]  ;;  %v366_v49 = vld [vmem:[%s1196_s1 + $0x3b0] sm:$0xff] }
  0x28   :  { %v305_v58 = vmax.f32 %v299_v46, %v304_v32  ;;  %v247_v61 = vadd.f32 %v246_v45, %v571_v3  ;;  %v212_v7 = vmin.f32 %v206_v52, %v211_v18  ;;  %v296_v8 = vmin.f32 %v290_v53, %v295_v43  ;;  %v342_v18 = vld [vmem:[%s1196_s1 + $0x390] sm:$0xff]  ;;  %v360_v43 = vld [vmem:[%s1196_s1 + $0x3a8] sm:$0xff] }
  0x29   :  { %v381_v9 = vsub.f32 %v556_v0, %v380_v51  ;;  %v385_v10 = vsub.f32 %v561_v1, %v384_v47  ;;  %v242_v14 = vmax.f32 %v236_v60, %v241_v50  ;;  %v253_v15 = vadd.f32 %v252_v56, %v576_v4  ;;  %v329_v32 = vld [vmem:[%s1196_s1 + $0x150] sm:$0xff]  ;;  %v345_v50 = vld [vmem:[%s1196_s1 + $0x168] sm:$0xff] }
  0x2a   :  { %v311_v13 = vmax.f32 %v305_v58, %v310_v36  ;;  %v391_v16 = vsub.f32 %v566_v2, %v390_v57  ;;  %216 = vmin.xlane.f32.xlu0 %v212_v7  ;;  %v302_v19 = vmin.f32 %v296_v8, %v301_v54  ;;  %v259_v20 = vadd.f32 %v258_v62, %v581_v5  ;;  %v333_v36 = vld [vmem:[%s1196_s1 + $0x158] sm:$0xff]  ;;  %v433_v54 = vld [vmem:[%s1196_s1 + $0x3f0] sm:$0xff]  ;;  %v444_v62 = vld [vmem:[%s1196_s1 + $0x400] sm:$0xff] }
  0x2b   :  { %v386_v22 = vmin.f32 %v381_v9, %v385_v10  ;;  %v397_v23 = vsub.f32 %v571_v3, %v396_v63  ;;  %v248_v27 = vmax.f32 %v242_v14, %v247_v61  ;;  %v403_v28 = vsub.f32 %v576_v4, %v402_v11  ;;  %v351_v60 = vld [vmem:[%s1196_s1 + $0x170] sm:$0xff]  ;;  %v357_v61 = vld [vmem:[%s1196_s1 + $0x178] sm:$0xff]  ;;  %v450_v10 = vld [vmem:[%s1196_s1 + $0x408] sm:$0xff] }
  0x2c   :  { %v317_v26 = vmax.f32 %v311_v13, %v316_v37  ;;  %v332_v29 = vadd.f32 %v331_v12, %v556_v0  ;;  %v308_v31 = vmin.f32 %v302_v19, %v307_v55  ;;  %v337_v34 = vadd.f32 %v336_v17, %v561_v1  ;;  %v339_v37 = vld [vmem:[%s1196_s1 + $0x160] sm:$0xff]  ;;  %v438_v55 = vld [vmem:[%s1196_s1 + $0x3f8] sm:$0xff]  ;;  %v435_v17 = vld [vmem:[%s1196_s1 + $0x1c8] sm:$0xff] }
  0x2d   :  { %v392_v33 = vmin.f32 %v386_v22, %v391_v16  ;;  %v343_v35 = vadd.f32 %v342_v18, %v566_v2  ;;  %v254_v38 = vmax.f32 %v248_v27, %v253_v15  ;;  %v265_v39 = vadd.f32 %v264_v21, %v586_v6  ;;  %v363_v13 = vld [vmem:[%s1196_s1 + $0x180] sm:$0xff]  ;;  %v456_v22 = vld [vmem:[%s1196_s1 + $0x410] sm:$0xff] }
  0x2e   :  { %320 = vmax.xlane.f32.xlu2 %v317_v26  ;;  %v409_v40 = vsub.f32 %v581_v5, %v408_v24  ;;  %v415_v41 = vsub.f32 %v586_v6, %v414_v25  ;;  %v314_v44 = vmin.f32 %v308_v31, %v313_v59  ;;  %v338_v46 = vmax.f32 %v332_v29, %v337_v34  ;;  %v431_v16 = vld [vmem:[%s1196_s1 + $0x1c0] sm:$0xff]  ;;  %v447_v29 = vld [vmem:[%s1196_s1 + $0x1d8] sm:$0xff] }
  0x2f   :  { %v398_v45 = vmin.f32 %v392_v33, %v397_v23  ;;  %v349_v48 = vadd.f32 %v348_v30, %v571_v3  ;;  %v260_v51 = vmax.f32 %v254_v38, %v259_v20  ;;  %v330_v47 = vsub.f32 %v556_v0, %v329_v32  ;;  %v441_v23 = vld [vmem:[%s1196_s1 + $0x1d0] sm:$0xff]  ;;  %v382_v32 = vld [vmem:[%s1196_s1 + $0x3b8] sm:$0xff] }
  0x30   :  { %v334_v52 = vsub.f32 %v561_v1, %v333_v36  ;;  %v340_v53 = vsub.f32 %v566_v2, %v339_v37  ;;  %318 = vmin.xlane.f32.xlu1 %v314_v44  ;;  %v344_v57 = vmax.f32 %v338_v46, %v343_v35  ;;  %v355_v58 = vadd.f32 %v354_v42, %v576_v4  ;;  %v453_v35 = vld [vmem:[%s1196_s1 + $0x1e0] sm:$0xff] }
  0x31   :  { %v404_v56 = vmin.f32 %v398_v45, %v403_v28  ;;  %v361_v59 = vadd.f32 %v360_v43, %v581_v5  ;;  %v266_v63 = vmax.f32 %v260_v51, %v265_v39  ;;  %v367_v7 = vadd.f32 %v366_v49, %v586_v6  ;;  %v462_v28 = vld [vmem:[%s1196_s1 + $0x418] sm:$0xff]  ;;  %v468_v44 = vld [vmem:[%s1196_s1 + $0x420] sm:$0xff] }
  0x32   :  { %v335_v8 = vmin.f32 %v330_v47, %v334_v52  ;;  %v346_v9 = vsub.f32 %v571_v3, %v345_v50  ;;  %v350_v12 = vmax.f32 %v344_v57, %v349_v48  ;;  %v434_v14 = vadd.f32 %v433_v54, %v556_v0  ;;  %v459_v48 = vld [vmem:[%s1196_s1 + $0x1e8] sm:$0xff]  ;;  %v399_v52 = vld [vmem:[%s1196_s1 + $0x3d0] sm:$0xff] }
  0x33   :  { %v410_v11 = vmin.f32 %v404_v56, %v409_v40  ;;  %v439_v15 = vadd.f32 %v438_v55, %v561_v1  ;;  %269 = vmax.xlane.f32.xlu0 %v266_v63  ;;  %v352_v19 = vsub.f32 %v576_v4, %v351_v60  ;;  %v358_v20 = vsub.f32 %v581_v5, %v357_v61  ;;  %v387_v40 = vld [vmem:[%s1196_s1 + $0x3c0] sm:$0xff]  ;;  %v484_v57 = vld [vmem:[%s1196_s1 + $0x428] sm:$0xff]  ;;  %v465_v63 = vld [vmem:[%s1196_s1 + $0x1f0] sm:$0xff] }
  0x34   :  { %v341_v18 = vmin.f32 %v335_v8, %v340_v53  ;;  %v445_v21 = vadd.f32 %v444_v62, %v566_v2  ;;  %v356_v25 = vmax.f32 %v350_v12, %v355_v58  ;;  %v451_v27 = vadd.f32 %v450_v10, %v571_v3  ;;  %v489_v58 = vld [vmem:[%s1196_s1 + $0x430] sm:$0xff]  ;;  %v411_v12 = vld [vmem:[%s1196_s1 + $0x3e0] sm:$0xff] }
  0x35   :  { %v416_v24 = vmin.f32 %v410_v11, %v415_v41  ;;  %v440_v26 = vmax.f32 %v434_v14, %v439_v15  ;;  %v364_v31 = vsub.f32 %v586_v6, %v363_v13  ;;  %v432_v33 = vsub.f32 %v556_v0, %v431_v16  ;;  %v393_v41 = vld [vmem:[%s1196_s1 + $0x3c8] sm:$0xff]  ;;  %v501_v13 = vld [vmem:[%s1196_s1 + $0x440] sm:$0xff] }
  0x36   :  { %v347_v30 = vmin.f32 %v341_v18, %v346_v9  ;;  %v436_v34 = vsub.f32 %v561_v1, %v435_v17  ;;  %v362_v36 = vmax.f32 %v356_v25, %v361_v59  ;;  %v457_v38 = vadd.f32 %v456_v22, %v576_v4  ;;  %v495_v59 = vld [vmem:[%s1196_s1 + $0x438] sm:$0xff]  ;;  %v507_v25 = vld [vmem:[%s1196_s1 + $0x448] sm:$0xff] }
  0x37   :  { %420 = vmin.xlane.f32.xlu2 %v416_v24  ;;  %v446_v37 = vmax.f32 %v440_v26, %v445_v21  ;;  %v442_v39 = vsub.f32 %v566_v2, %v441_v23  ;;  %v463_v43 = vadd.f32 %v462_v28, %v581_v5  ;;  %v448_v46 = vsub.f32 %v571_v3, %v447_v29  ;;  %v482_v18 = vld [vmem:[%s1196_s1 + $0x1f8] sm:$0xff]  ;;  %v417_v24 = vld [vmem:[%s1196_s1 + $0x3e8] sm:$0xff] }
  0x38   :  { %v353_v42 = vmin.f32 %v347_v30, %v352_v19  ;;  %v437_v45 = vmin.f32 %v432_v33, %v436_v34  ;;  %v368_v49 = vmax.f32 %v362_v36, %v367_v7  ;;  %v454_v51 = vsub.f32 %v576_v4, %v453_v35  ;;  %v405_v7 = vld [vmem:[%s1196_s1 + $0x3d8] sm:$0xff]  ;;  %v486_v19 = vld [vmem:[%s1196_s1 + $0x200] sm:$0xff]  ;;  %v492_v26 = vld [vmem:[%s1196_s1 + $0x208] sm:$0xff] }
  0x39   :  { %v452_v50 = vmax.f32 %v446_v37, %v451_v27  ;;  %v383_v47 = vadd.f32 %v382_v32, %v556_v0  ;;  %v388_v55 = vadd.f32 %v387_v40, %v561_v1  ;;  %v394_v56 = vadd.f32 %v393_v41, %v566_v2  ;;  %v513_v35 = vld [vmem:[%s1196_s1 + $0x450] sm:$0xff]  ;;  %v504_v41 = vld [vmem:[%s1196_s1 + $0x218] sm:$0xff] }
  0x3a   :  { %v359_v53 = vmin.f32 %v353_v42, %v358_v20  ;;  %v443_v54 = vmin.f32 %v437_v45, %v442_v39  ;;  %371 = vmax.xlane.f32.xlu1 %v368_v49  ;;  %v469_v61 = vadd.f32 %v468_v44, %v586_v6  ;;  %v460_v62 = vsub.f32 %v581_v5, %v459_v48 }
  0x3b   :  { %v458_v60 = vmax.f32 %v452_v50, %v457_v38  ;;  %v389_v10 = vmax.f32 %v383_v47, %v388_v55  ;;  %v400_v11 = vadd.f32 %v399_v52, %v571_v3  ;;  %v485_v15 = vadd.f32 %v484_v57, %v556_v0  ;;  %v516_v52 = vld [vmem:[%s1196_s1 + $0x228] sm:$0xff] }
  0x3c   :  { %v365_v8 = vmin.f32 %v359_v53, %v364_v31  ;;  %v449_v9 = vmin.f32 %v443_v54, %v448_v46  ;;  %v490_v16 = vadd.f32 %v489_v58, %v561_v1  ;;  %v496_v17 = vadd.f32 %v495_v59, %v566_v2  ;;  %v498_v31 = vld [vmem:[%s1196_s1 + $0x210] sm:$0xff] }
  0x3d   :  { %v464_v14 = vmax.f32 %v458_v60, %v463_v43  ;;  %v466_v21 = vsub.f32 %v586_v6, %v465_v63  ;;  %v395_v22 = vmax.f32 %v389_v10, %v394_v56  ;;  %v406_v23 = vadd.f32 %v405_v7, %v576_v4 }
  0x3e   :  { %369 = vmin.xlane.f32.xlu0 %v365_v8  ;;  %v455_v20 = vmin.f32 %v449_v9, %v454_v51  ;;  %v412_v28 = vadd.f32 %v411_v12, %v581_v5  ;;  %v491_v29 = vmax.f32 %v485_v15, %v490_v16  ;;  %v502_v30 = vadd.f32 %v501_v13, %v571_v3 }
  0x3f   :  { %v470_v27 = vmax.f32 %v464_v14, %v469_v61  ;;  %v401_v34 = vmax.f32 %v395_v22, %v400_v11  ;;  %v483_v32 = vsub.f32 %v556_v0, %v482_v18  ;;  %v487_v36 = vsub.f32 %v561_v1, %v486_v19  ;;  %v519_v0 = vld [vmem:[%s1196_s1 + $0x458] sm:$0xff] }
  0x40   :  { %v461_v33 = vmin.f32 %v455_v20, %v460_v62  ;;  %v418_v37 = vadd.f32 %v417_v24, %v586_v6  ;;  %v497_v38 = vmax.f32 %v491_v29, %v496_v17  ;;  %v508_v39 = vadd.f32 %v507_v25, %v576_v4 }
  0x41   :  { %473 = vmax.xlane.f32.xlu2 %v470_v27  ;;  %v493_v40 = vsub.f32 %v566_v2, %v492_v26  ;;  %v407_v43 = vmax.f32 %v401_v34, %v406_v23  ;;  %v488_v44 = vmin.f32 %v483_v32, %v487_v36  ;;  %v499_v1 = vsub.f32 %v571_v3, %v498_v31  ;;  %v510_v2 = vld [vmem:[%s1196_s1 + $0x220] sm:$0xff] }
  0x42   :  { %v467_v42 = vmin.f32 %v461_v33, %v466_v21  ;;  %v503_v45 = vmax.f32 %v497_v38, %v502_v30  ;;  %v514_v46 = vadd.f32 %v513_v35, %v581_v5  ;;  %v505_v50 = vsub.f32 %v576_v4, %v504_v41 }
  0x43   :  { %v413_v48 = vmax.f32 %v407_v43, %v412_v28  ;;  %v494_v49 = vmin.f32 %v488_v44, %v493_v40  ;;  %v520_v47 = vadd.f32 %v519_v0, %v586_v6  ;;  %v511_v54 = vsub.f32 %v581_v5, %v510_v2 }
  0x44   :  { %471 = vmin.xlane.f32.xlu1 %v467_v42  ;;  %v509_v51 = vmax.f32 %v503_v45, %v508_v39  ;;  %v517_v57 = vsub.f32 %v586_v6, %v516_v52  ;;  %v11_v63 = vlaneseq }
  0x45   :  { %v419_v3 = vmax.f32 %v413_v48, %v418_v37  ;;  %v500_v53 = vmin.f32 %v494_v49, %v499_v1 }
  0x46   :  { %v515_v55 = vmax.f32 %v509_v51, %v514_v46  ;;  %v1160_v7 = vand.u32 127, %v11_v63 }
  0x47   :  { %422 = vmax.xlane.f32.xlu0 %v419_v3  ;;  %v506_v56 = vmin.f32 %v500_v53, %v505_v50 }
  0x48   :  { %v521_v58 = vmax.f32 %v515_v55, %v520_v47  ;;  %vm67_vm0 = vcmp.eq.s32.totalorder %v1160_v7, 0  ;;  %vm70_vm1 = vcmp.eq.s32.totalorder %v1160_v7, 16  ;;  %vm72_vm2 = vcmp.eq.s32.totalorder %v1160_v7, 32 }
  0x49   :  { %v512_v59 = vmin.f32 %v506_v56, %v511_v54  ;;  %vm118_vm3 = vcmp.eq.s32.totalorder %v1160_v7, 1  ;;  %vm121_vm4 = vcmp.eq.s32.totalorder %v1160_v7, 17  ;;  %vm123_vm5 = vcmp.eq.s32.totalorder %v1160_v7, 33 }
  0x4a   :  { %vm169_vm6 = vcmp.eq.s32.totalorder %v1160_v7, 2  ;;  %vm172_vm7 = vcmp.eq.s32.totalorder %v1160_v7, 18  ;;  %vm174_vm8 = vcmp.eq.s32.totalorder %v1160_v7, 34  ;;  %vm220_vm9 = vcmp.eq.s32.totalorder %v1160_v7, 3 }
  0x4b   :  { %v518_v4 = vmin.f32 %v512_v59, %v517_v57  ;;  %vm223_vm10 = vcmp.eq.s32.totalorder %v1160_v7, 19  ;;  %vm225_vm11 = vcmp.eq.s32.totalorder %v1160_v7, 35  ;;  %vm271_vm12 = vcmp.eq.s32.totalorder %v1160_v7, 4 }
  0x4c   :  { %524 = vmax.xlane.f32.xlu1 %v521_v58  ;;  %vm274_vm13 = vcmp.eq.s32.totalorder %v1160_v7, 20  ;;  %vm276_vm14 = vcmp.eq.s32.totalorder %v1160_v7, 36  ;;  %vm322_vm15 = vcmp.eq.s32.totalorder %v1160_v7, 5 }
  0x4f   :  { %522 = vmin.xlane.f32.xlu0 %v518_v4 }
  0x86   :  { %v166_v61 = vpop.xlane.xlu2 %165 }
  0x88   :  { %v115_v60 = vpop.xlane.xlu1 %114 }
  0x8a   :  { %v64_v62 = vpop.xlane.xlu0 %63 }
  0x8e   :  { %v168_v9 = vpop.xlane.xlu2 %167 }
  0x8f   :  { %v170_v15 = vsub.f32 %v166_v61, %v168_v9 }
  0x90   :  { %v117_v8 = vpop.xlane.xlu1 %116 }
  0x91   :  { %v119_v11 = vsub.f32 %v115_v60, %v117_v8 }
  0x93   :  { %v66_v5 = vpop.xlane.xlu0 %65 }
  0x94   :  { %v68_v10 = vsub.f32 %v64_v62, %v66_v5 }
  0x96   :  { %v69_v6 = vsel %vm67_vm0, %v68_v10, 0.0  ;;  %v268_v21 = vpop.xlane.xlu2 %267  ;;  %vm325_vm0 = vcmp.eq.s32.totalorder %v1160_v7, 21 }
  0x97   :  { %v71_v12 = vsel %vm70_vm1, %v64_v62, %v69_v6  ;;  %vm327_vm1 = vcmp.eq.s32.totalorder %v1160_v7, 37 }
  0x98   :  { %v73_v13 = vsel %vm72_vm2, %v66_v5, %v71_v12  ;;  %vm373_vm2 = vcmp.eq.s32.totalorder %v1160_v7, 6 }
  0x99   :  { %v120_v14 = vsel %vm118_vm3, %v119_v11, %v73_v13  ;;  %vm376_vm3 = vcmp.eq.s32.totalorder %v1160_v7, 22 }
  0x9a   :  { %v122_v16 = vsel %vm121_vm4, %v115_v60, %v120_v14  ;;  %v219_v17 = vpop.xlane.xlu1 %218  ;;  %vm378_vm4 = vcmp.eq.s32.totalorder %v1160_v7, 38 }
  0x9b   :  { %v124_v18 = vsel %vm123_vm5, %v117_v8, %v122_v16  ;;  %vm424_vm5 = vcmp.eq.s32.totalorder %v1160_v7, 7 }
  0x9c   :  { %v171_v19 = vsel %vm169_vm6, %v170_v15, %v124_v18  ;;  %vm427_vm6 = vcmp.eq.s32.totalorder %v1160_v7, 23 }
  0x9d   :  { %v173_v20 = vsel %vm172_vm7, %v166_v61, %v171_v19  ;;  %v217_v22 = vpop.xlane.xlu0 %216  ;;  %vm429_vm7 = vcmp.eq.s32.totalorder %v1160_v7, 39 }
  0x9e   :  { %v221_v23 = vsub.f32 %v217_v22, %v219_v17  ;;  %v175_v24 = vsel %vm174_vm8, %v168_v9, %v173_v20  ;;  %vm475_vm8 = vcmp.eq.s32.totalorder %v1160_v7, 8 }
  0xa0   :  { %v222_v25 = vsel %vm220_vm9, %v221_v23, %v175_v24  ;;  %vm478_vm9 = vcmp.eq.s32.totalorder %v1160_v7, 24 }
  0xa1   :  { %v224_v27 = vsel %vm223_vm10, %v217_v22, %v222_v25  ;;  %v321_v29 = vpop.xlane.xlu2 %320  ;;  %vm480_vm10 = vcmp.eq.s32.totalorder %v1160_v7, 40 }
  0xa2   :  { %v226_v31 = vsel %vm225_vm11, %v219_v17, %v224_v27  ;;  %vm526_vm11 = vcmp.eq.s32.totalorder %v1160_v7, 9 }
  0xa3   :  { %v319_v26 = vpop.xlane.xlu1 %318 }
  0xa4   :  { %v323_v32 = vsub.f32 %v319_v26, %v321_v29 }
  0xa6   :  { %v270_v28 = vpop.xlane.xlu0 %269 }
  0xa7   :  { %v272_v30 = vsub.f32 %v268_v21, %v270_v28 }
  0xa9   :  { %v273_v33 = vsel %vm271_vm12, %v272_v30, %v226_v31  ;;  %vm529_vm12 = vcmp.eq.s32.totalorder %v1160_v7, 25 }
  0xaa   :  { %v275_v34 = vsel %vm274_vm13, %v268_v21, %v273_v33  ;;  %v421_v39 = vpop.xlane.xlu2 %420  ;;  %vm531_vm13 = vcmp.eq.s32.totalorder %v1160_v7, 41 }
  0xab   :  { %v277_v35 = vsel %vm276_vm14, %v270_v28, %v275_v34 }
  0xac   :  { %v324_v37 = vsel %vm322_vm15, %v323_v32, %v277_v35 }
  0xad   :  { %v372_v36 = vpop.xlane.xlu1 %371  ;;  %v326_v40 = vsel %vm325_vm0, %v319_v26, %v324_v37 }
  0xae   :  { %v328_v42 = vsel %vm327_vm1, %v321_v29, %v326_v40 }
  0xb1   :  { %v370_v38 = vpop.xlane.xlu0 %369 }
  0xb2   :  { %v374_v41 = vsub.f32 %v370_v38, %v372_v36 }
  0xb4   :  { %v375_v43 = vsel %vm373_vm2, %v374_v41, %v328_v42  ;;  %v474_v45 = vpop.xlane.xlu2 %473 }
  0xb5   :  { %v377_v44 = vsel %vm376_vm3, %v370_v38, %v375_v43 }
  0xb6   :  { %v379_v2 = vsel %vm378_vm4, %v372_v36, %v377_v44 }
  0xb7   :  { %v472_v0 = vpop.xlane.xlu1 %471 }
  0xb8   :  { %v476_v49 = vsub.f32 %v472_v0, %v474_v45 }
  0xba   :  { %v423_v1 = vpop.xlane.xlu0 %422 }
  0xbb   :  { %v425_v46 = vsub.f32 %v421_v39, %v423_v1 }
  0xbd   :  { %v426_v48 = vsel %vm424_vm5, %v425_v46, %v379_v2 }
  0xbe   :  { %v428_v50 = vsel %vm427_vm6, %v421_v39, %v426_v48 }
  0xbf   :  { %v430_v51 = vsel %vm429_vm7, %v423_v1, %v428_v50  ;;  %v525_v52 = vpop.xlane.xlu1 %524 }
  0xc0   :  { %v477_v47 = vsel %vm475_vm8, %v476_v49, %v430_v51 }
  0xc1   :  { %v479_v3 = vsel %vm478_vm9, %v472_v0, %v477_v47 }
  0xc2   :  { %v523_v53 = vpop.xlane.xlu0 %522  ;;  %v481_v55 = vsel %vm480_vm10, %v474_v45, %v479_v3 }
  0xc3   :  { %v527_v54 = vsub.f32 %v523_v53, %v525_v52 }
  0xc5   :  { %v528_v56 = vsel %vm526_vm11, %v527_v54, %v481_v55 }
  0xc6   :  { %v530_v57 = vsel %vm529_vm12, %v523_v53, %v528_v56 }
  0xc7   :  { %v532_v58 = vsel %vm531_vm13, %v525_v52, %v530_v57 }
  0xc8   :  { %533 = vst [vmem:[%s1197_s2] sm:$0xff] %v532_v58 }

</bundles_post_ra>
